<compile_context>
chip_gen: v7x
topology: tpu7x:2x2x1
jax: 0.10.0
libtpu: 0.0.40
codegen_flags: <defaults>
</compile_context>

<pallas_src>
import math
import functools

import jax
import jax.numpy as jnp
from jax.experimental import pallas as pl
from jax.experimental.pallas import tpu as pltpu

EPS = 1e-6
_MIB = 1024 * 1024


def _rms_norm_f32(v, w, eps=EPS):
    # v: (M, H) float32, w: (H,) float32
    ms = jnp.mean(v * v, axis=-1, keepdims=True)
    return v * jax.lax.rsqrt(ms + eps) * w


def sandwich_block_kernel(x_ref, wq_ref, wk_ref, wv_ref, wo_ref,
                          wg_ref, wu_ref, w2_ref,
                          bqkv_ref, bo_ref, norms_ref,
                          o_ref, acc_ref, *, num_heads):
    Bt, S, H = x_ref.shape
    hd = H // num_heads
    scale = 1.0 / math.sqrt(hd)
    M = Bt * S

    # Fold batch*seq into the matmul M dimension (leading-dim collapse only).
    x = x_ref[...].astype(jnp.float32).reshape(M, H)

    n1 = norms_ref[0, :]
    n2 = norms_ref[1, :]
    n3 = norms_ref[2, :]
    n4 = norms_ref[3, :]

    # ---------------- attention half of the sandwich ----------------
    residual = x
    xn = _rms_norm_f32(x, n1).astype(jnp.bfloat16)            # norm1 (f32 math)

    # Fused projection + bias + (q-only) 1/sqrt(hd) scale + bf16 cast: no
    # separate f32 q/k/v copies stay live alongside the bf16 ones.
    q = ((jnp.dot(xn, wq_ref[...], preferred_element_type=jnp.float32)
          + bqkv_ref[0, :]) * scale).astype(jnp.bfloat16)
    k = (jnp.dot(xn, wk_ref[...], preferred_element_type=jnp.float32)
         + bqkv_ref[1, :]).astype(jnp.bfloat16)
    v = (jnp.dot(xn, wv_ref[...], preferred_element_type=jnp.float32)
         + bqkv_ref[2, :]).astype(jnp.bfloat16)

    # Heads are processed one at a time; each head's context is folded
    # directly through its Wo row-block into the VMEM-scratch f32 accumulator,
    # so there is no concat and only one head's (Bt,S,S) probs are live.
    # head_dim should be a multiple of 128 so the slices are lane-aligned.
    # TODO(synk): for large S (esp. v7x, 64 MiB VMEM) switch to flash-style
    # query tiling with an online softmax instead of full (S,S) scores.
    # TODO(synk): switch to lax.fori_loop + pl.ds(h*hd, hd) slices for large
    # num_heads (static unroll grows code size linearly in num_heads).
    for h in range(num_heads):
        lo = h * hd
        qh = q[:, lo:lo + hd].reshape(Bt, S, hd)
        kh = k[:, lo:lo + hd].reshape(Bt, S, hd)
        vh = v[:, lo:lo + hd].reshape(Bt, S, hd)
        # scores: contract the head dim directly (no explicit transpose of k)
        s = jnp.einsum('bqd,bkd->bqk', qh, kh,
                       preferred_element_type=jnp.float32)          # (Bt,S,S)
        # f32 softmax; the divide is replaced by an EUP approx reciprocal
        s_max = jnp.max(s, axis=-1, keepdims=True)
        e = jnp.exp(s - s_max)
        inv_denom = pl.reciprocal(jnp.sum(e, axis=-1, keepdims=True),
                                  approx=True)
        p = (e * inv_denom).astype(jnp.bfloat16)
        oh = jnp.einsum('bqk,bkd->bqd', p, vh,
                        preferred_element_type=jnp.float32)         # (Bt,S,hd)
        oh = oh.reshape(M, hd).astype(jnp.bfloat16)
        # per-head output projection: rows [lo:lo+hd] of Wo (sublane slice)
        proj = jnp.dot(oh, wo_ref[lo:lo + hd, :],
                       preferred_element_type=jnp.float32)
        if h == 0:
            # seed the accumulator with the output bias: no zeros pass and no
            # separate "+ bo" elementwise pass afterwards
            acc_ref[...] = proj + bo_ref[0, :]
        else:
            acc_ref[...] += proj
    attn = acc_ref[...]
    # TODO(synk): key_padding_mask path (attention_mask is not None) not implemented.

    x = _rms_norm_f32(residual + attn, n2)                    # norm2

    # ---------------- MLP half of the sandwich ----------------
    residual = x
    xn = _rms_norm_f32(x, n3).astype(jnp.bfloat16)            # norm3

    gate = jnp.dot(xn, wg_ref[...], preferred_element_type=jnp.float32)  # (M, I)
    val = jnp.dot(xn, wu_ref[...], preferred_element_type=jnp.float32)   # (M, I)
    mlp = (gate * jax.nn.sigmoid(gate)) * val                 # SiLU(gate) * value, f32
    mlp = jnp.dot(mlp.astype(jnp.bfloat16), w2_ref[...],
                  preferred_element_type=jnp.float32)         # (M, H)
    # hidden dropout is identity in eval mode

    out = _rms_norm_f32(residual + mlp, n4)                   # norm4
    o_ref[...] = out.reshape(Bt, S, H).astype(o_ref.dtype)


def _tpu_vmem_capacity_bytes():
    """Physical VMEM per core; conservative 64 MiB (v7x) if the query fails."""
    try:
        info = pltpu.get_tpu_info()
        for attr in ("vmem_capacity_bytes", "vmem_bytes", "vmem_size_bytes"):
            val = getattr(info, attr, None)
            if val:
                return int(val)
    except Exception:
        pass
    return 64 * _MIB


def _choose_bt(B, S, max_rows):
    """Largest divisor of B with Bt*S <= max_rows, while keeping >= 2 grid
    steps when B > 1 so the 'parallel' batch axis can feed both v7x cores."""
    limit = B if B == 1 else max(1, B // 2)
    bt = 1
    for cand in range(1, limit + 1):
        if B % cand == 0 and cand * S <= max_rows:
            bt = cand
    return bt


def sandwich_block(x, params, num_heads, *, bt=None):
    B, S, H = x.shape
    wq, wk, wv, wo, wg, wu, w2, bqkv, bo, norms = params

    assert H % num_heads == 0
    hd = H // num_heads
    # Wo row-block slices need hd to be a multiple of the bf16 sublane pack;
    # hd % 128 == 0 additionally makes every per-head lane slice a whole
    # 128-lane block (best MXU utilisation on v5e/v6e/v7x).
    assert hd % 16 == 0, "head_dim must be a multiple of 16 (bf16 sublane pack)"
    assert H % 128 == 0 and S % 8 == 0, "blocks must be lane/sublane aligned"

    # Generation-aware VMEM budget: leave ~20% headroom for compiler scratch.
    vmem_cap = _tpu_vmem_capacity_bytes()
    vmem_budget = int(vmem_cap * 0.8)
    max_rows = 256 if vmem_cap <= 64 * _MIB else 1024          # v7x vs v5e/v6e

    if bt is None:
        bt = _choose_bt(B, S, max_rows)
    assert B % bt == 0, "batch tile must divide batch"

    # bf16 weights for the MXU; biases / norm weights stay f32.
    wq, wk, wv, wo, wg, wu, w2 = (w.astype(jnp.bfloat16)
                                  for w in (wq, wk, wv, wo, wg, wu, w2))
    bqkv = bqkv.astype(jnp.float32)
    bo = bo.astype(jnp.float32)
    norms = norms.astype(jnp.float32)

    # Whole-weight residency only works while the weights fit comfortably.
    # TODO(synk): add a K/N-tiled ('arbitrary') grid axis over the weight N dim
    # (or split into QKV+attn / out-proj / MLP pallas_calls) for realistic
    # H / intermediate sizes that do not fit VMEM, especially v7x (64 MiB).
    weight_bytes = sum(int(w.size) for w in (wq, wk, wv, wo, wg, wu, w2)) * 2
    assert weight_bytes <= vmem_budget // 2, (
        "resident weights exceed the VMEM budget; K/N weight tiling required")

    def resident_spec(arr):
        # Constant-index block: single buffer — no point double-buffering a
        # block that never changes across grid steps (halves weight VMEM).
        nd = arr.ndim
        return pl.BlockSpec(arr.shape, lambda b, _nd=nd: (0,) * _nd,
                            pipeline_mode=pl.Buffered(1))

    kernel = functools.partial(sandwich_block_kernel, num_heads=num_heads)
    return pl.pallas_call(
        kernel,
        out_shape=jax.ShapeDtypeStruct((B, S, H), x.dtype),
        grid=(B // bt,),
        in_specs=[
            pl.BlockSpec((bt, S, H), lambda b: (b, 0, 0)),     # x (double-buffered)
            resident_spec(wq), resident_spec(wk), resident_spec(wv),
            resident_spec(wo), resident_spec(wg), resident_spec(wu),
            resident_spec(w2),
            resident_spec(bqkv), resident_spec(bo), resident_spec(norms),
        ],
        out_specs=pl.BlockSpec((bt, S, H), lambda b: (b, 0, 0)),
        scratch_shapes=[pltpu.VMEM((bt * S, H), jnp.float32)],  # attn accumulator
        compiler_params=pltpu.CompilerParams(
            dimension_semantics=("parallel",),
            vmem_limit_bytes=vmem_budget),
    )(x, wq, wk, wv, wo, wg, wu, w2, bqkv, bo, norms)


def reference(x, params, num_heads, eps=EPS):
    """Pure-JAX f32 reference mirroring the PyTorch forward (mask=None, eval)."""
    wq, wk, wv, wo, wg, wu, w2, bqkv, bo, norms = params

    def rms(v, w):
        ms = jnp.mean(v * v, axis=-1, keepdims=True)
        return v * jax.lax.rsqrt(ms + eps) * w

    B, S, H = x.shape
    hd = H // num_heads

    residual = x
    xn = rms(x, norms[0])
    q = xn @ wq + bqkv[0]
    k = xn @ wk + bqkv[1]
    v = xn @ wv + bqkv[2]
    q = q.reshape(B, S, num_heads, hd).transpose(0, 2, 1, 3)
    k = k.reshape(B, S, num_heads, hd).transpose(0, 2, 1, 3)
    v = v.reshape(B, S, num_heads, hd).transpose(0, 2, 1, 3)
    s = jnp.einsum('bhqd,bhkd->bhqk', q, k) / math.sqrt(hd)
    p = jax.nn.softmax(s, axis=-1)
    o = jnp.einsum('bhqk,bhkd->bhqd', p, v).transpose(0, 2, 1, 3).reshape(B, S, H)
    attn = o @ wo + bo[0]
    x = rms(residual + attn, norms[1])

    residual = x
    xn = rms(x, norms[2])
    gate = xn @ wg
    val = xn @ wu
    mlp = (jax.nn.silu(gate) * val) @ w2
    return rms(residual + mlp, norms[3])


if __name__ == "__main__":
    # Small demo shapes, chosen so head_dim = 128 (full lane block per head)
    # and every matmul dim is a multiple of 128.
    B, S, H, NH, I = 2, 16, 256, 2, 256

    key = jax.random.PRNGKey(0)
    ks = jax.random.split(key, 10)
    x = jax.random.normal(ks[0], (B, S, H), jnp.float32)

    def bf16_round(w):
        # Keep weights bf16-representable so the f32 reference and the bf16
        # kernel see identical weights (only activation rounding differs).
        return w.astype(jnp.bfloat16).astype(jnp.float32)

    # Synthetic parameters, [in, out] layout (transposed vs. PyTorch Linear).
    wq = bf16_round(jax.random.normal(ks[1], (H, H), jnp.float32) * 0.05)
    wk = bf16_round(jax.random.normal(ks[2], (H, H), jnp.float32) * 0.05)
    wv = bf16_round(jax.random.normal(ks[3], (H, H), jnp.float32) * 0.05)
    wo = bf16_round(jax.random.normal(ks[4], (H, H), jnp.float32) * 0.05)   # out_proj.weight.T
    wg = bf16_round(jax.random.normal(ks[5], (H, I), jnp.float32) * 0.05)   # fc1 gate half
    wu = bf16_round(jax.random.normal(ks[6], (H, I), jnp.float32) * 0.05)   # fc1 value half
    w2 = bf16_round(jax.random.normal(ks[7], (I, H), jnp.float32) * 0.05)   # fc2.weight.T
    bqkv = jax.random.normal(ks[8], (3, H), jnp.float32) * 0.02             # in_proj_bias (q,k,v rows)
    bo = jax.random.normal(ks[9], (1, H), jnp.float32) * 0.02               # out_proj.bias
    norms = jnp.ones((4, H), jnp.float32)                                   # RMSNorm weights

    params = (wq, wk, wv, wo, wg, wu, w2, bqkv, bo, norms)

    out = sandwich_block(x, params, NH)
    out = jax.block_until_ready(out)

    ref = reference(x, params, NH)
    err = float(jnp.max(jnp.abs(out - ref)))
    assert jnp.allclose(out, ref, atol=5e-2, rtol=5e-2), f"max err {err}"

    print("KERNEL_OK")
</pallas_src>

<mosaic_0001>
module attributes {stable_mosaic.version = 11 : i64} {
  func.func @sandwich_block_kernel(%arg0: i32, %arg1: memref<1x16x256xf32, #tpu.memory_space<vmem>>, %arg2: memref<256x256xbf16, #tpu.memory_space<vmem>>, %arg3: memref<256x256xbf16, #tpu.memory_space<vmem>>, %arg4: memref<256x256xbf16, #tpu.memory_space<vmem>>, %arg5: memref<256x256xbf16, #tpu.memory_space<vmem>>, %arg6: memref<256x256xbf16, #tpu.memory_space<vmem>>, %arg7: memref<256x256xbf16, #tpu.memory_space<vmem>>, %arg8: memref<256x256xbf16, #tpu.memory_space<vmem>>, %arg9: memref<3x256xf32, #tpu.memory_space<vmem>>, %arg10: memref<1x256xf32, #tpu.memory_space<vmem>>, %arg11: memref<4x256xf32, #tpu.memory_space<vmem>>, %arg12: memref<1x16x256xf32, #tpu.memory_space<vmem>>, %arg13: memref<16x256xf32, #tpu.memory_space<vmem>>) attributes {dimension_semantics = [#tpu.dimension_semantics<parallel>], iteration_bounds = array<i64: 2>, scalar_prefetch = 0 : i64, scratch_operands = 1 : i64, tpu.core_type = #tpu.core_type<tc>, window_params = [{transform_indices = @transform_0, window_bounds = array<i64: 1, 16, 256>}, {pipeline_mode = #tpu.pipeline_mode<synchronous>, transform_indices = @transform_1, window_bounds = array<i64: 256, 256>}, {pipeline_mode = #tpu.pipeline_mode<synchronous>, transform_indices = @transform_2, window_bounds = array<i64: 256, 256>}, {pipeline_mode = #tpu.pipeline_mode<synchronous>, transform_indices = @transform_3, window_bounds = array<i64: 256, 256>}, {pipeline_mode = #tpu.pipeline_mode<synchronous>, transform_indices = @transform_4, window_bounds = array<i64: 256, 256>}, {pipeline_mode = #tpu.pipeline_mode<synchronous>, transform_indices = @transform_5, window_bounds = array<i64: 256, 256>}, {pipeline_mode = #tpu.pipeline_mode<synchronous>, transform_indices = @transform_6, window_bounds = array<i64: 256, 256>}, {pipeline_mode = #tpu.pipeline_mode<synchronous>, transform_indices = @transform_7, window_bounds = array<i64: 256, 256>}, {pipeline_mode = #tpu.pipeline_mode<synchronous>, transform_indices = @transform_8, window_bounds = array<i64: 3, 256>}, {pipeline_mode = #tpu.pipeline_mode<synchronous>, transform_indices = @transform_9, window_bounds = array<i64: 1, 256>}, {pipeline_mode = #tpu.pipeline_mode<synchronous>, transform_indices = @transform_10, window_bounds = array<i64: 4, 256>}, {transform_indices = @transform_11, window_bounds = array<i64: 1, 16, 256>}]} {
    %c0 = arith.constant 0 : index
    %c0_0 = arith.constant 0 : index
    %c0_1 = arith.constant 0 : index
    %0 = vector.load %arg1[%c0, %c0_0, %c0_1] : memref<1x16x256xf32, #tpu.memory_space<vmem>>, vector<1x16x256xf32>
    %1 = vector.shape_cast %0 : vector<1x16x256xf32> to vector<16x256xf32>
    %c0_2 = arith.constant 0 : index
    %c0_3 = arith.constant 0 : index
    %2 = vector.load %arg11[%c0_2, %c0_3] : memref<4x256xf32, #tpu.memory_space<vmem>>, vector<1x256xf32>
    %3 = vector.shape_cast %2 : vector<1x256xf32> to vector<256xf32>
    %c1 = arith.constant 1 : index
    %c0_4 = arith.constant 0 : index
    %4 = vector.load %arg11[%c1, %c0_4] : memref<4x256xf32, #tpu.memory_space<vmem>>, vector<1x256xf32>
    %5 = vector.shape_cast %4 : vector<1x256xf32> to vector<256xf32>
    %c2 = arith.constant 2 : index
    %c0_5 = arith.constant 0 : index
    %6 = vector.load %arg11[%c2, %c0_5] : memref<4x256xf32, #tpu.memory_space<vmem>>, vector<1x256xf32>
    %7 = vector.shape_cast %6 : vector<1x256xf32> to vector<256xf32>
    %c3 = arith.constant 3 : index
    %c0_6 = arith.constant 0 : index
    %8 = vector.load %arg11[%c3, %c0_6] : memref<4x256xf32, #tpu.memory_space<vmem>>, vector<1x256xf32>
    %9 = vector.shape_cast %8 : vector<1x256xf32> to vector<256xf32>
    %10 = arith.mulf %1, %1 : vector<16x256xf32>
    %cst = arith.constant dense<0.000000e+00> : vector<16xf32>
    %11 = vector.multi_reduction <add>, %10, %cst [1] : vector<16x256xf32> to vector<16xf32>
    %12 = vector.shape_cast %11 : vector<16xf32> to vector<16x1xf32>
    %cst_7 = arith.constant 2.560000e+02 : f32
    %13 = vector.broadcast %cst_7 : f32 to vector<16x1xf32>
    %14 = arith.divf %12, %13 : vector<16x1xf32>
    %cst_8 = arith.constant 9.99999997E-7 : f32
    %15 = vector.broadcast %cst_8 : f32 to vector<16x1xf32>
    %16 = arith.addf %14, %15 : vector<16x1xf32>
    %17 = math.rsqrt %16 : vector<16x1xf32>
    %18 = vector.broadcast %17 : vector<16x1xf32> to vector<16x256xf32>
    %19 = arith.mulf %1, %18 : vector<16x256xf32>
    %20 = vector.shape_cast %3 : vector<256xf32> to vector<1x256xf32>
    %21 = vector.broadcast %20 : vector<1x256xf32> to vector<16x256xf32>
    %22 = arith.mulf %19, %21 : vector<16x256xf32>
    %23 = arith.truncf %22 : vector<16x256xf32> to vector<16x256xbf16>
    %c0_9 = arith.constant 0 : index
    %c0_10 = arith.constant 0 : index
    %24 = vector.load %arg2[%c0_9, %c0_10] : memref<256x256xbf16, #tpu.memory_space<vmem>>, vector<256x256xbf16>
    %cst_11 = arith.constant dense<0.000000e+00> : vector<16x256xf32>
    %25 = tpu.matmul %23, %24, %cst_11 {dimension_numbers = #tpu.dot_dimension_numbers<[1], [0], [0], [1], [0, 0, 1, 1], [], []>} : vector<16x256xbf16>, vector<256x256xbf16>, vector<16x256xf32> -> vector<16x256xf32>
    %c0_12 = arith.constant 0 : index
    %c0_13 = arith.constant 0 : index
    %26 = vector.load %arg9[%c0_12, %c0_13] : memref<3x256xf32, #tpu.memory_space<vmem>>, vector<1x256xf32>
    %27 = vector.shape_cast %26 : vector<1x256xf32> to vector<256xf32>
    %28 = vector.shape_cast %27 : vector<256xf32> to vector<1x256xf32>
    %29 = vector.broadcast %28 : vector<1x256xf32> to vector<16x256xf32>
    %30 = arith.addf %25, %29 : vector<16x256xf32>
    %cst_14 = arith.constant 0.0883883461 : f32
    %31 = vector.broadcast %cst_14 : f32 to vector<16x256xf32>
    %32 = arith.mulf %30, %31 : vector<16x256xf32>
    %33 = arith.truncf %32 : vector<16x256xf32> to vector<16x256xbf16>
    %c0_15 = arith.constant 0 : index
    %c0_16 = arith.constant 0 : index
    %34 = vector.load %arg3[%c0_15, %c0_16] : memref<256x256xbf16, #tpu.memory_space<vmem>>, vector<256x256xbf16>
    %cst_17 = arith.constant dense<0.000000e+00> : vector<16x256xf32>
    %35 = tpu.matmul %23, %34, %cst_17 {dimension_numbers = #tpu.dot_dimension_numbers<[1], [0], [0], [1], [0, 0, 1, 1], [], []>} : vector<16x256xbf16>, vector<256x256xbf16>, vector<16x256xf32> -> vector<16x256xf32>
    %c1_18 = arith.constant 1 : index
    %c0_19 = arith.constant 0 : index
    %36 = vector.load %arg9[%c1_18, %c0_19] : memref<3x256xf32, #tpu.memory_space<vmem>>, vector<1x256xf32>
    %37 = vector.shape_cast %36 : vector<1x256xf32> to vector<256xf32>
    %38 = vector.shape_cast %37 : vector<256xf32> to vector<1x256xf32>
    %39 = vector.broadcast %38 : vector<1x256xf32> to vector<16x256xf32>
    %40 = arith.addf %35, %39 : vector<16x256xf32>
    %41 = arith.truncf %40 : vector<16x256xf32> to vector<16x256xbf16>
    %c0_20 = arith.constant 0 : index
    %c0_21 = arith.constant 0 : index
    %42 = vector.load %arg4[%c0_20, %c0_21] : memref<256x256xbf16, #tpu.memory_space<vmem>>, vector<256x256xbf16>
    %cst_22 = arith.constant dense<0.000000e+00> : vector<16x256xf32>
    %43 = tpu.matmul %23, %42, %cst_22 {dimension_numbers = #tpu.dot_dimension_numbers<[1], [0], [0], [1], [0, 0, 1, 1], [], []>} : vector<16x256xbf16>, vector<256x256xbf16>, vector<16x256xf32> -> vector<16x256xf32>
    %c2_23 = arith.constant 2 : index
    %c0_24 = arith.constant 0 : index
    %44 = vector.load %arg9[%c2_23, %c0_24] : memref<3x256xf32, #tpu.memory_space<vmem>>, vector<1x256xf32>
    %45 = vector.shape_cast %44 : vector<1x256xf32> to vector<256xf32>
    %46 = vector.shape_cast %45 : vector<256xf32> to vector<1x256xf32>
    %47 = vector.broadcast %46 : vector<1x256xf32> to vector<16x256xf32>
    %48 = arith.addf %43, %47 : vector<16x256xf32>
    %49 = arith.truncf %48 : vector<16x256xf32> to vector<16x256xbf16>
    %50 = vector.extract_strided_slice %33 {offsets = [0, 0], sizes = [16, 128], strides = [1, 1]} : vector<16x256xbf16> to vector<16x128xbf16>
    %51 = vector.shape_cast %50 : vector<16x128xbf16> to vector<1x16x128xbf16>
    %52 = vector.extract_strided_slice %41 {offsets = [0, 0], sizes = [16, 128], strides = [1, 1]} : vector<16x256xbf16> to vector<16x128xbf16>
    %53 = vector.shape_cast %52 : vector<16x128xbf16> to vector<1x16x128xbf16>
    %54 = vector.extract_strided_slice %49 {offsets = [0, 0], sizes = [16, 128], strides = [1, 1]} : vector<16x256xbf16> to vector<16x128xbf16>
    %55 = vector.shape_cast %54 : vector<16x128xbf16> to vector<1x16x128xbf16>
    "tpu.trace_start"() <{level = 10 : i32, message = "bqd,bkd->bqk"}> : () -> ()
    %cst_25 = arith.constant dense<0.000000e+00> : vector<1x16x16xf32>
    %56 = tpu.matmul %51, %53, %cst_25 {dimension_numbers = #tpu.dot_dimension_numbers<[2], [2], [1], [1], [0, 0, 0, 1, 1, 1], [0], [0]>} : vector<1x16x128xbf16>, vector<1x16x128xbf16>, vector<1x16x16xf32> -> vector<1x16x16xf32>
    "tpu.trace_stop"() : () -> ()
    %cst_26 = arith.constant dense<0xFF800000> : vector<1x16xf32>
    %57 = vector.multi_reduction <maximumf>, %56, %cst_26 [2] : vector<1x16x16xf32> to vector<1x16xf32>
    %58 = vector.shape_cast %57 : vector<1x16xf32> to vector<1x16x1xf32>
    %59 = vector.broadcast %58 : vector<1x16x1xf32> to vector<1x16x16xf32>
    %60 = arith.subf %56, %59 : vector<1x16x16xf32>
    %61 = math.exp %60 : vector<1x16x16xf32>
    %cst_27 = arith.constant dense<0.000000e+00> : vector<1x16xf32>
    %62 = vector.multi_reduction <add>, %61, %cst_27 [2] : vector<1x16x16xf32> to vector<1x16xf32>
    %63 = vector.shape_cast %62 : vector<1x16xf32> to vector<1x16x1xf32>
    %64 = tpu.reciprocal %63 {approx = true} : vector<1x16x1xf32> -> vector<1x16x1xf32>
    %65 = vector.broadcast %64 : vector<1x16x1xf32> to vector<1x16x16xf32>
    %66 = arith.mulf %61, %65 : vector<1x16x16xf32>
    %67 = arith.truncf %66 : vector<1x16x16xf32> to vector<1x16x16xbf16>
    "tpu.trace_start"() <{level = 10 : i32, message = "bqk,bkd->bqd"}> : () -> ()
    %cst_28 = arith.constant dense<0.000000e+00> : vector<1x16x128xf32>
    %68 = tpu.matmul %67, %55, %cst_28 {dimension_numbers = #tpu.dot_dimension_numbers<[2], [1], [1], [2], [0, 0, 0, 1, 1, 2], [0], [0]>} : vector<1x16x16xbf16>, vector<1x16x128xbf16>, vector<1x16x128xf32> -> vector<1x16x128xf32>
    "tpu.trace_stop"() : () -> ()
    %69 = vector.shape_cast %68 : vector<1x16x128xf32> to vector<16x128xf32>
    %70 = arith.truncf %69 : vector<16x128xf32> to vector<16x128xbf16>
    %c0_29 = arith.constant 0 : index
    %c0_30 = arith.constant 0 : index
    %71 = vector.load %arg5[%c0_29, %c0_30] : memref<256x256xbf16, #tpu.memory_space<vmem>>, vector<128x256xbf16>
    %cst_31 = arith.constant dense<0.000000e+00> : vector<16x256xf32>
    %72 = tpu.matmul %70, %71, %cst_31 {dimension_numbers = #tpu.dot_dimension_numbers<[1], [0], [0], [1], [0, 0, 1, 1], [], []>} : vector<16x128xbf16>, vector<128x256xbf16>, vector<16x256xf32> -> vector<16x256xf32>
    %c0_32 = arith.constant 0 : index
    %c0_33 = arith.constant 0 : index
    %73 = vector.load %arg10[%c0_32, %c0_33] : memref<1x256xf32, #tpu.memory_space<vmem>>, vector<1x256xf32>
    %74 = vector.shape_cast %73 : vector<1x256xf32> to vector<256xf32>
    %75 = vector.shape_cast %74 : vector<256xf32> to vector<1x256xf32>
    %76 = vector.broadcast %75 : vector<1x256xf32> to vector<16x256xf32>
    %77 = arith.addf %72, %76 : vector<16x256xf32>
    %c0_34 = arith.constant 0 : index
    %c0_35 = arith.constant 0 : index
    %78 = vector.load %arg13[%c0_34, %c0_35] : memref<16x256xf32, #tpu.memory_space<vmem>>, vector<16x256xf32>
    tpu.vector_store %arg13[%c0_34, %c0_35], %77 {strides = array<i32>} : memref<16x256xf32, #tpu.memory_space<vmem>>, vector<16x256xf32>,
    %79 = vector.extract_strided_slice %33 {offsets = [0, 128], sizes = [16, 128], strides = [1, 1]} : vector<16x256xbf16> to vector<16x128xbf16>
    %80 = vector.shape_cast %79 : vector<16x128xbf16> to vector<1x16x128xbf16>
    %81 = vector.extract_strided_slice %41 {offsets = [0, 128], sizes = [16, 128], strides = [1, 1]} : vector<16x256xbf16> to vector<16x128xbf16>
    %82 = vector.shape_cast %81 : vector<16x128xbf16> to vector<1x16x128xbf16>
    %83 = vector.extract_strided_slice %49 {offsets = [0, 128], sizes = [16, 128], strides = [1, 1]} : vector<16x256xbf16> to vector<16x128xbf16>
    %84 = vector.shape_cast %83 : vector<16x128xbf16> to vector<1x16x128xbf16>
    "tpu.trace_start"() <{level = 10 : i32, message = "bqd,bkd->bqk"}> : () -> ()
    %cst_36 = arith.constant dense<0.000000e+00> : vector<1x16x16xf32>
    %85 = tpu.matmul %80, %82, %cst_36 {dimension_numbers = #tpu.dot_dimension_numbers<[2], [2], [1], [1], [0, 0, 0, 1, 1, 1], [0], [0]>} : vector<1x16x128xbf16>, vector<1x16x128xbf16>, vector<1x16x16xf32> -> vector<1x16x16xf32>
    "tpu.trace_stop"() : () -> ()
    %cst_37 = arith.constant dense<0xFF800000> : vector<1x16xf32>
    %86 = vector.multi_reduction <maximumf>, %85, %cst_37 [2] : vector<1x16x16xf32> to vector<1x16xf32>
    %87 = vector.shape_cast %86 : vector<1x16xf32> to vector<1x16x1xf32>
    %88 = vector.broadcast %87 : vector<1x16x1xf32> to vector<1x16x16xf32>
    %89 = arith.subf %85, %88 : vector<1x16x16xf32>
    %90 = math.exp %89 : vector<1x16x16xf32>
    %cst_38 = arith.constant dense<0.000000e+00> : vector<1x16xf32>
    %91 = vector.multi_reduction <add>, %90, %cst_38 [2] : vector<1x16x16xf32> to vector<1x16xf32>
    %92 = vector.shape_cast %91 : vector<1x16xf32> to vector<1x16x1xf32>
    %93 = tpu.reciprocal %92 {approx = true} : vector<1x16x1xf32> -> vector<1x16x1xf32>
    %94 = vector.broadcast %93 : vector<1x16x1xf32> to vector<1x16x16xf32>
    %95 = arith.mulf %90, %94 : vector<1x16x16xf32>
    %96 = arith.truncf %95 : vector<1x16x16xf32> to vector<1x16x16xbf16>
    "tpu.trace_start"() <{level = 10 : i32, message = "bqk,bkd->bqd"}> : () -> ()
    %cst_39 = arith.constant dense<0.000000e+00> : vector<1x16x128xf32>
    %97 = tpu.matmul %96, %84, %cst_39 {dimension_numbers = #tpu.dot_dimension_numbers<[2], [1], [1], [2], [0, 0, 0, 1, 1, 2], [0], [0]>} : vector<1x16x16xbf16>, vector<1x16x128xbf16>, vector<1x16x128xf32> -> vector<1x16x128xf32>
    "tpu.trace_stop"() : () -> ()
    %98 = vector.shape_cast %97 : vector<1x16x128xf32> to vector<16x128xf32>
    %99 = arith.truncf %98 : vector<16x128xf32> to vector<16x128xbf16>
    %c128 = arith.constant 128 : index
    %c0_40 = arith.constant 0 : index
    %100 = vector.load %arg5[%c128, %c0_40] : memref<256x256xbf16, #tpu.memory_space<vmem>>, vector<128x256xbf16>
    %cst_41 = arith.constant dense<0.000000e+00> : vector<16x256xf32>
    %101 = tpu.matmul %99, %100, %cst_41 {dimension_numbers = #tpu.dot_dimension_numbers<[1], [0], [0], [1], [0, 0, 1, 1], [], []>} : vector<16x128xbf16>, vector<128x256xbf16>, vector<16x256xf32> -> vector<16x256xf32>
    %c0_42 = arith.constant 0 : index
    %c0_43 = arith.constant 0 : index
    %102 = vector.load %arg13[%c0_42, %c0_43] : memref<16x256xf32, #tpu.memory_space<vmem>>, vector<16x256xf32>
    %103 = arith.addf %102, %101 : vector<16x256xf32>
    %c0_44 = arith.constant 0 : index
    %c0_45 = arith.constant 0 : index
    %104 = vector.load %arg13[%c0_44, %c0_45] : memref<16x256xf32, #tpu.memory_space<vmem>>, vector<16x256xf32>
    tpu.vector_store %arg13[%c0_44, %c0_45], %103 {strides = array<i32>} : memref<16x256xf32, #tpu.memory_space<vmem>>, vector<16x256xf32>,
    %c0_46 = arith.constant 0 : index
    %c0_47 = arith.constant 0 : index
    %105 = vector.load %arg13[%c0_46, %c0_47] : memref<16x256xf32, #tpu.memory_space<vmem>>, vector<16x256xf32>
    %106 = arith.addf %1, %105 : vector<16x256xf32>
    %107 = arith.mulf %106, %106 : vector<16x256xf32>
    %cst_48 = arith.constant dense<0.000000e+00> : vector<16xf32>
    %108 = vector.multi_reduction <add>, %107, %cst_48 [1] : vector<16x256xf32> to vector<16xf32>
    %109 = vector.shape_cast %108 : vector<16xf32> to vector<16x1xf32>
    %cst_49 = arith.constant 2.560000e+02 : f32
    %110 = vector.broadcast %cst_49 : f32 to vector<16x1xf32>
    %111 = arith.divf %109, %110 : vector<16x1xf32>
    %cst_50 = arith.constant 9.99999997E-7 : f32
    %112 = vector.broadcast %cst_50 : f32 to vector<16x1xf32>
    %113 = arith.addf %111, %112 : vector<16x1xf32>
    %114 = math.rsqrt %113 : vector<16x1xf32>
    %115 = vector.broadcast %114 : vector<16x1xf32> to vector<16x256xf32>
    %116 = arith.mulf %106, %115 : vector<16x256xf32>
    %117 = vector.shape_cast %5 : vector<256xf32> to vector<1x256xf32>
    %118 = vector.broadcast %117 : vector<1x256xf32> to vector<16x256xf32>
    %119 = arith.mulf %116, %118 : vector<16x256xf32>
    %120 = arith.mulf %119, %119 : vector<16x256xf32>
    %cst_51 = arith.constant dense<0.000000e+00> : vector<16xf32>
    %121 = vector.multi_reduction <add>, %120, %cst_51 [1] : vector<16x256xf32> to vector<16xf32>
    %122 = vector.shape_cast %121 : vector<16xf32> to vector<16x1xf32>
    %cst_52 = arith.constant 2.560000e+02 : f32
    %123 = vector.broadcast %cst_52 : f32 to vector<16x1xf32>
    %124 = arith.divf %122, %123 : vector<16x1xf32>
    %cst_53 = arith.constant 9.99999997E-7 : f32
    %125 = vector.broadcast %cst_53 : f32 to vector<16x1xf32>
    %126 = arith.addf %124, %125 : vector<16x1xf32>
    %127 = math.rsqrt %126 : vector<16x1xf32>
    %128 = vector.broadcast %127 : vector<16x1xf32> to vector<16x256xf32>
    %129 = arith.mulf %119, %128 : vector<16x256xf32>
    %130 = vector.shape_cast %7 : vector<256xf32> to vector<1x256xf32>
    %131 = vector.broadcast %130 : vector<1x256xf32> to vector<16x256xf32>
    %132 = arith.mulf %129, %131 : vector<16x256xf32>
    %133 = arith.truncf %132 : vector<16x256xf32> to vector<16x256xbf16>
    %c0_54 = arith.constant 0 : index
    %c0_55 = arith.constant 0 : index
    %134 = vector.load %arg6[%c0_54, %c0_55] : memref<256x256xbf16, #tpu.memory_space<vmem>>, vector<256x256xbf16>
    %cst_56 = arith.constant dense<0.000000e+00> : vector<16x256xf32>
    %135 = tpu.matmul %133, %134, %cst_56 {dimension_numbers = #tpu.dot_dimension_numbers<[1], [0], [0], [1], [0, 0, 1, 1], [], []>} : vector<16x256xbf16>, vector<256x256xbf16>, vector<16x256xf32> -> vector<16x256xf32>
    %c0_57 = arith.constant 0 : index
    %c0_58 = arith.constant 0 : index
    %136 = vector.load %arg7[%c0_57, %c0_58] : memref<256x256xbf16, #tpu.memory_space<vmem>>, vector<256x256xbf16>
    %cst_59 = arith.constant dense<0.000000e+00> : vector<16x256xf32>
    %137 = tpu.matmul %133, %136, %cst_59 {dimension_numbers = #tpu.dot_dimension_numbers<[1], [0], [0], [1], [0, 0, 1, 1], [], []>} : vector<16x256xbf16>, vector<256x256xbf16>, vector<16x256xf32> -> vector<16x256xf32>
    %138 = arith.negf %135 : vector<16x256xf32>
    %139 = math.exp %138 : vector<16x256xf32>
    %cst_60 = arith.constant 1.000000e+00 : f32
    %140 = vector.broadcast %cst_60 : f32 to vector<16x256xf32>
    %141 = arith.addf %140, %139 : vector<16x256xf32>
    %142 = arith.divf %140, %141 : vector<16x256xf32>
    %143 = arith.mulf %135, %142 : vector<16x256xf32>
    %144 = arith.mulf %143, %137 : vector<16x256xf32>
    %145 = arith.truncf %144 : vector<16x256xf32> to vector<16x256xbf16>
    %c0_61 = arith.constant 0 : index
    %c0_62 = arith.constant 0 : index
    %146 = vector.load %arg8[%c0_61, %c0_62] : memref<256x256xbf16, #tpu.memory_space<vmem>>, vector<256x256xbf16>
    %cst_63 = arith.constant dense<0.000000e+00> : vector<16x256xf32>
    %147 = tpu.matmul %145, %146, %cst_63 {dimension_numbers = #tpu.dot_dimension_numbers<[1], [0], [0], [1], [0, 0, 1, 1], [], []>} : vector<16x256xbf16>, vector<256x256xbf16>, vector<16x256xf32> -> vector<16x256xf32>
    %148 = arith.addf %119, %147 : vector<16x256xf32>
    %149 = arith.mulf %148, %148 : vector<16x256xf32>
    %cst_64 = arith.constant dense<0.000000e+00> : vector<16xf32>
    %150 = vector.multi_reduction <add>, %149, %cst_64 [1] : vector<16x256xf32> to vector<16xf32>
    %151 = vector.shape_cast %150 : vector<16xf32> to vector<16x1xf32>
    %cst_65 = arith.constant 2.560000e+02 : f32
    %152 = vector.broadcast %cst_65 : f32 to vector<16x1xf32>
    %153 = arith.divf %151, %152 : vector<16x1xf32>
    %cst_66 = arith.constant 9.99999997E-7 : f32
    %154 = vector.broadcast %cst_66 : f32 to vector<16x1xf32>
    %155 = arith.addf %153, %154 : vector<16x1xf32>
    %156 = math.rsqrt %155 : vector<16x1xf32>
    %157 = vector.broadcast %156 : vector<16x1xf32> to vector<16x256xf32>
    %158 = arith.mulf %148, %157 : vector<16x256xf32>
    %159 = vector.shape_cast %9 : vector<256xf32> to vector<1x256xf32>
    %160 = vector.broadcast %159 : vector<1x256xf32> to vector<16x256xf32>
    %161 = arith.mulf %158, %160 : vector<16x256xf32>
    %162 = vector.shape_cast %161 : vector<16x256xf32> to vector<1x16x256xf32>
    %c0_67 = arith.constant 0 : index
    %c0_68 = arith.constant 0 : index
    %c0_69 = arith.constant 0 : index
    %163 = vector.load %arg12[%c0_67, %c0_68, %c0_69] : memref<1x16x256xf32, #tpu.memory_space<vmem>>, vector<1x16x256xf32>
    tpu.vector_store %arg12[%c0_67, %c0_68, %c0_69], %162 {strides = array<i32>} : memref<1x16x256xf32, #tpu.memory_space<vmem>>, vector<1x16x256xf32>,
    return
  }
  func.func @transform_0(%arg0: i32) -> (i32, i32, i32) {
    %c0_i32 = arith.constant 0 : i32
    %c0_i32_0 = arith.constant 0 : i32
    %c0_i32_1 = arith.constant 0 : i32
    return %arg0, %c0_i32, %c0_i32_0 : i32, i32, i32
  }
  func.func @transform_1(%arg0: i32) -> (i32, i32) {
    %c0_i32 = arith.constant 0 : i32
    %c0_i32_0 = arith.constant 0 : i32
    %c0_i32_1 = arith.constant 0 : i32
    return %c0_i32, %c0_i32_0 : i32, i32
  }
  func.func @transform_2(%arg0: i32) -> (i32, i32) {
    %c0_i32 = arith.constant 0 : i32
    %c0_i32_0 = arith.constant 0 : i32
    %c0_i32_1 = arith.constant 0 : i32
    return %c0_i32, %c0_i32_0 : i32, i32
  }
  func.func @transform_3(%arg0: i32) -> (i32, i32) {
    %c0_i32 = arith.constant 0 : i32
    %c0_i32_0 = arith.constant 0 : i32
    %c0_i32_1 = arith.constant 0 : i32
    return %c0_i32, %c0_i32_0 : i32, i32
  }
  func.func @transform_4(%arg0: i32) -> (i32, i32) {
    %c0_i32 = arith.constant 0 : i32
    %c0_i32_0 = arith.constant 0 : i32
    %c0_i32_1 = arith.constant 0 : i32
    return %c0_i32, %c0_i32_0 : i32, i32
  }
  func.func @transform_5(%arg0: i32) -> (i32, i32) {
    %c0_i32 = arith.constant 0 : i32
    %c0_i32_0 = arith.constant 0 : i32
    %c0_i32_1 = arith.constant 0 : i32
    return %c0_i32, %c0_i32_0 : i32, i32
  }
  func.func @transform_6(%arg0: i32) -> (i32, i32) {
    %c0_i32 = arith.constant 0 : i32
    %c0_i32_0 = arith.constant 0 : i32
    %c0_i32_1 = arith.constant 0 : i32
    return %c0_i32, %c0_i32_0 : i32, i32
  }
  func.func @transform_7(%arg0: i32) -> (i32, i32) {
    %c0_i32 = arith.constant 0 : i32
    %c0_i32_0 = arith.constant 0 : i32
    %c0_i32_1 = arith.constant 0 : i32
    return %c0_i32, %c0_i32_0 : i32, i32
  }
  func.func @transform_8(%arg0: i32) -> (i32, i32) {
    %c0_i32 = arith.constant 0 : i32
    %c0_i32_0 = arith.constant 0 : i32
    %c0_i32_1 = arith.constant 0 : i32
    return %c0_i32, %c0_i32_0 : i32, i32
  }
  func.func @transform_9(%arg0: i32) -> (i32, i32) {
    %c0_i32 = arith.constant 0 : i32
    %c0_i32_0 = arith.constant 0 : i32
    %c0_i32_1 = arith.constant 0 : i32
    return %c0_i32, %c0_i32_0 : i32, i32
  }
  func.func @transform_10(%arg0: i32) -> (i32, i32) {
    %c0_i32 = arith.constant 0 : i32
    %c0_i32_0 = arith.constant 0 : i32
    %c0_i32_1 = arith.constant 0 : i32
    return %c0_i32, %c0_i32_0 : i32, i32
  }
  func.func @transform_11(%arg0: i32) -> (i32, i32, i32) {
    %c0_i32 = arith.constant 0 : i32
    %c0_i32_0 = arith.constant 0 : i32
    %c0_i32_1 = arith.constant 0 : i32
    return %arg0, %c0_i32, %c0_i32_0 : i32, i32, i32
  }
}

</mosaic_0001>

<bundles_post_ra>
// kernel: tpu_custom_call.1
= control target key start
LH: loop header
LB: loop body
LE: loop exit
PB: predicated region body
PF: predicated region fallthrough
CT: control target
= control target key end

     0   :  { %s4596_s0 = inlined_call_operand.hbm [shape: f32[2,16,256], index: 0, kind: input, shape index: {}]   ;;  %s4597_s1 = inlined_call_operand.hbm [shape: bf16[256,256], index: 1, kind: input, shape index: {}]   ;;  %s4598_s2 = inlined_call_operand.hbm [shape: bf16[256,256], index: 2, kind: input, shape index: {}]   ;;  %s4599_s3 = inlined_call_operand.hbm [shape: bf16[256,256], index: 3, kind: input, shape index: {}]   ;;  %s4600_s4 = inlined_call_operand.hbm [shape: bf16[256,256], index: 4, kind: input, shape index: {}]   ;;  %s4601_s5 = inlined_call_operand.hbm [shape: bf16[256,256], index: 5, kind: input, shape index: {}]   ;;  %s4602_s6 = inlined_call_operand.hbm [shape: bf16[256,256], index: 6, kind: input, shape index: {}]   ;;  %s4603_s7 = inlined_call_operand.hbm [shape: bf16[256,256], index: 7, kind: input, shape index: {}]   ;;  %s4604_s8 = inlined_call_operand.vmem [shape: f32[3,256], index: 8, kind: input, shape index: {}]   ;;  %s4605_s9 = inlined_call_operand.vmem [shape: f32[1,256], index: 9, kind: input, shape index: {}]   ;;  %s4606_s10 = inlined_call_operand.vmem [shape: f32[4,256], index: 10, kind: input, shape index: {}]   ;;  %s4607_s11 = inlined_call_operand.hbm [shape: f32[2,16,256], index: 11, kind: output, shape index: {}]  }
   0x1   :  { %4613 = sst [smem:[#allocation24_spill]] %s4597_s1 }
   0x2   :  { %4614 = sst [smem:[#allocation25_spill]] %s4604_s8 }
   0x3   :  { %4615 = sst [smem:[#allocation26_spill]] %s4605_s9 }
   0x4   :  { %4616 = sst [smem:[#allocation27_spill]] %s4607_s11 }
   0x5   :  { %16 = vsyncpa [#allocation4], 0 }
   0x6   :  { %18 = vsyncpa [#allocation4 + $0x1], 0 }
   0x7   :  { %19 = vsyncpa [#allocation7], 0 }
   0x8   :  { %20 = vsyncpa [#allocation10], 0 }
   0x9   :  { %21 = vsyncpa [#allocation13], 0 }
   0xa   :  { %22 = vsyncpa [#allocation16], 0 }
   0xb   :  { %23 = vsyncpa [#allocation5], 0 }
   0xc   :  { %25 = vsyncpa [#allocation5 + $0x1], 0  ;;  %s4058_s17 = smov 0   ;;  %s4060_s18 = smov 0  }
   0xd   :  { %s4062_s19 = smov 0   ;;  %s4064_s20 = smov 0  }
   0xe LB: > { %s3980_s21 = smov [#allocation6]   ;;  %s4079_s23 = sadd.s32 4294967295, %s3978_s20   ;;  %s3978_s20 = sphi %s4064_s20, %s4644_s20   ;;  %s3974_s19 = sphi %s4062_s19, %s4643_s19   ;;  %s3970_s18 = sphi %s4060_s18, %s4642_s18   ;;  %s3966_s17 = sphi %s4058_s17, %s4641_s17  }
   0xf   : > { %s310_s22 = sshll.u32 %s3980_s21, 4  ;;  %p2852_p0 = scmp.ge.s32.totalorder %s3978_s20, 1  ;;  %s4084_s22 = int_to_ptr.vmem [resolvable:$true] %s310_s22 }
  0x10   : > { %p4610_p1 = scmp.eq.s32.totalorder %s4079_s23, 0  ;;  %p298_p2 = scmp.lt.s32.totalorder %s3978_s20, 3 }
  0x11   : > { %s3981_s25 = smov [#allocation9]   ;;  %s3982_s28 = smov [#allocation12]  }
  0x12   : > { %p4086_p3 = pnand %p2852_p0, %p298_p2  ;;  %s336_s26 = sshll.u32 %s3981_s25, 4  ;;  %s4099_s26 = int_to_ptr.vmem [resolvable:$true] %s336_s26 }
  0x13   : > { %s362_s29 = sshll.u32 %s3982_s28, 4  ;;  %s4619_s1 = sld [smem:[#allocation24_spill]]  ;;  %s4101_s29 = int_to_ptr.vmem [resolvable:$true] %s362_s29 }
  0x14   : > { %s4617_s24 = scalar_select %p4086_p3, 1, 0 }
  0x15   : > { %p3188_p5 = pneg %p4086_p3 }
  0x17   : > { %p4095_p6 = pnand %p3188_p5, %p4610_p1 }
  0x19   : > { %s3670_s13 = scalar_lea.hbm %s4619_s1, 4096  ;;  %p4111_p8 = pneg %p4095_p6 }
  0x1a   : > { %p3671_p7 = scmp.ne.s32.totalorder %s4619_s1, %s3670_s13  ;;  %p3677_p11 = scmp.lt.u32.totalorder %s3670_s13, %s4619_s1 }
  0x1c   : > { %p3673_p9 = pnand %p4111_p8, %p3671_p7 }
  0x1e   : > { %p3674_p10 = pneg %p3673_p9 }
  0x20   : > { %p3679_p12 = pnand %p3677_p11, %p3674_p10 }
  0x22   : > { %3682 = shalt.err (!%p3679_p12)
}
  0x23   : > { %s3683_s28 = scalar_lea.vmem %s4084_s22, 4096  ;;  %p3691_p5 = scmp.lt.s32.totalorder %s4084_s22, %s4084_s22 }
  0x24   : > { %p3684_p13 = scmp.ne.s32.totalorder %s4084_s22, %s3683_s28  ;;  %p3692_p4 = scmp.lt.s32.totalorder %s3683_s28, %s3683_s28 }
  0x26   : > { %p3686_p0 = pnand %p3684_p13, %p4111_p8  ;;  %p3693_p7 = por %p3692_p4, %p3691_p5 }
  0x28   : > { %p3687_p2 = pneg %p3686_p0 }
  0x2a   : > { %p3694_p9 = pnand %p3693_p7, %p3687_p2 }
  0x2c   : > { %3697 = shalt.err (!%p3694_p9)
}
  0x2d   : > { %s3983_s30 = smov 128   ;;  %s3984_s12 = smov 8  }
  0x2e   : > { %3191 = dma.hbm_to_vmem [thread:$0]  (!%p4095_p6), %s4619_s1, 4096, %s4084_s22, [#allocation7], %s3983_s30, %s3983_s30, %s3984_s12  }
  0x2f   : > { %s3698_s25 = scalar_lea.hbm %s4599_s3, 4096 }
  0x30   : > { %p3699_p4 = scmp.ne.s32.totalorder %s4599_s3, %s3698_s25  ;;  %p3705_p12 = scmp.lt.u32.totalorder %s3698_s25, %s4599_s3 }
  0x32   : > { %p3701_p10 = pnand %p3699_p4, %p4111_p8 }
  0x34   : > { %p3702_p11 = pneg %p3701_p10 }
  0x36   : > { %p3707_p13 = pnand %p3705_p12, %p3702_p11 }
  0x38   : > { %3710 = shalt.err (!%p3707_p13)
}
  0x39   : > { %s3711_s22 = scalar_lea.vmem %s4099_s26, 4096  ;;  %p3719_p7 = scmp.lt.s32.totalorder %s4099_s26, %s4099_s26 }
  0x3a   : > { %p3712_p0 = scmp.ne.s32.totalorder %s4099_s26, %s3711_s22  ;;  %p3720_p9 = scmp.lt.s32.totalorder %s3711_s22, %s3711_s22 }
  0x3c   : > { %p3714_p2 = pnand %p3712_p0, %p4111_p8  ;;  %p3721_p4 = por %p3720_p9, %p3719_p7 }
  0x3e   : > { %p3715_p5 = pneg %p3714_p2 }
  0x40   : > { %p3722_p10 = pnand %p3721_p4, %p3715_p5 }
  0x42   : > { %3725 = shalt.err (!%p3722_p10)
}
  0x43   : > { %3197 = dma.hbm_to_vmem [thread:$0]  (!%p4095_p6), %s4599_s3, 4096, %s4099_s26, [#allocation10], %s3983_s30, %s3983_s30, %s3984_s12  }
  0x44   : > { %s3726_s14 = scalar_lea.hbm %s4601_s5, 4096 }
  0x45   : > { %p3727_p11 = scmp.ne.s32.totalorder %s4601_s5, %s3726_s14  ;;  %p3733_p0 = scmp.lt.u32.totalorder %s3726_s14, %s4601_s5 }
  0x47   : > { %p3729_p12 = pnand %p3727_p11, %p4111_p8 }
  0x49   : > { %p3730_p13 = pneg %p3729_p12 }
  0x4b   : > { %p3735_p2 = pnand %p3733_p0, %p3730_p13 }
  0x4d   : > { %3738 = shalt.err (!%p3735_p2)
}
  0x4e   : > { %s3739_s26 = scalar_lea.vmem %s4101_s29, 4096  ;;  %p3747_p4 = scmp.lt.s32.totalorder %s4101_s29, %s4101_s29 }
  0x4f   : > { %p3740_p5 = scmp.ne.s32.totalorder %s4101_s29, %s3739_s26  ;;  %p3748_p10 = scmp.lt.s32.totalorder %s3739_s26, %s3739_s26 }
  0x51   : > { %p3742_p7 = pnand %p3740_p5, %p4111_p8  ;;  %p3749_p11 = por %p3748_p10, %p3747_p4 }
  0x53   : > { %p3743_p9 = pneg %p3742_p7 }
  0x55   : > { %p3750_p12 = pnand %p3749_p11, %p3743_p9 }
  0x57   : > { %3753 = shalt.err (!%p3750_p12)
}
  0x58   : > { %3203 = dma.hbm_to_vmem [thread:$0]  (!%p4095_p6), %s4601_s5, 4096, %s4101_s29, [#allocation13], %s3983_s30, %s3983_s30, %s3984_s12  }
  0x59   : > { %s3985_s9 = smov [#allocation8]   ;;  %s3986_s13 = smov [#allocation11]  }
  0x5a   : > { %s323_s11 = sshll.u32 %s3985_s9, 4  ;;  %s349_s14 = sshll.u32 %s3986_s13, 4  ;;  %s324_s11 = int_to_ptr.vmem [resolvable:$true] %s323_s11  ;;  %s350_s14 = int_to_ptr.vmem [resolvable:$true] %s349_s14 }
  0x5b   : > { %s3754_s25 = scalar_lea.hbm %s4598_s2, 4096 }
  0x5c   : > { %p3755_p13 = scmp.ne.s32.totalorder %s4598_s2, %s3754_s25  ;;  %p3761_p5 = scmp.lt.u32.totalorder %s3754_s25, %s4598_s2 }
  0x5e   : > { %p3757_p0 = pnand %p3755_p13, %p4111_p8 }
  0x60   : > { %p3758_p2 = pneg %p3757_p0 }
  0x62   : > { %p3763_p7 = pnand %p3761_p5, %p3758_p2 }
  0x64   : > { %3766 = shalt.err (!%p3763_p7)
}
  0x65   : > { %s3767_s29 = scalar_lea.vmem %s324_s11, 4096  ;;  %p3775_p11 = scmp.lt.s32.totalorder %s324_s11, %s324_s11 }
  0x66   : > { %p3768_p9 = scmp.ne.s32.totalorder %s324_s11, %s3767_s29  ;;  %p3776_p12 = scmp.lt.s32.totalorder %s3767_s29, %s3767_s29 }
  0x68   : > { %p3770_p4 = pnand %p3768_p9, %p4111_p8  ;;  %p3777_p1 = por %p3776_p12, %p3775_p11 }
  0x6a   : > { %p3771_p10 = pneg %p3770_p4 }
  0x6c   : > { %p3778_p3 = pnand %p3777_p1, %p3771_p10 }
  0x6e   : > { %3781 = shalt.err (!%p3778_p3)
}
  0x6f   : > { %3194 = dma.hbm_to_vmem [thread:$0]  (!%p4095_p6), %s4598_s2, 4096, %s324_s11, [#allocation7], %s3983_s30, %s3983_s30, %s3984_s12  }
  0x70   : > { %s3782_s15 = scalar_lea.hbm %s4600_s4, 4096 }
  0x71   : > { %p3783_p1 = scmp.ne.s32.totalorder %s4600_s4, %s3782_s15  ;;  %p3789_p0 = scmp.lt.u32.totalorder %s3782_s15, %s4600_s4 }
  0x73   : > { %p3785_p3 = pnand %p3783_p1, %p4111_p8 }
  0x75   : > { %p3786_p13 = pneg %p3785_p3 }
  0x77   : > { %p3791_p2 = pnand %p3789_p0, %p3786_p13 }
  0x79   : > { %3794 = shalt.err (!%p3791_p2)
}
  0x7a   : > { %s3795_s22 = scalar_lea.vmem %s350_s14, 4096  ;;  %p3803_p4 = scmp.lt.s32.totalorder %s350_s14, %s350_s14 }
  0x7b   : > { %p3796_p5 = scmp.ne.s32.totalorder %s350_s14, %s3795_s22  ;;  %p3804_p10 = scmp.lt.s32.totalorder %s3795_s22, %s3795_s22 }
  0x7d   : > { %p3798_p7 = pnand %p3796_p5, %p4111_p8  ;;  %p3805_p11 = por %p3804_p10, %p3803_p4 }
  0x7f   : > { %p3799_p9 = pneg %p3798_p7 }
  0x81   : > { %p3806_p12 = pnand %p3805_p11, %p3799_p9 }
  0x83   : > { %3809 = shalt.err (!%p3806_p12)
}
  0x84   : > { %3200 = dma.hbm_to_vmem [thread:$0]  (!%p4095_p6), %s4600_s4, 4096, %s350_s14, [#allocation10], %s3983_s30, %s3983_s30, %s3984_s12  }
  0x85   : > { %s3987_s1 = smov [#allocation14]   ;;  %s3988_s9 = smov [#allocation15]  }
  0x86   : > { %s375_s8 = sshll.u32 %s3987_s1, 4  ;;  %s388_s13 = sshll.u32 %s3988_s9, 4  ;;  %s376_s8 = int_to_ptr.vmem [resolvable:$true] %s375_s8  ;;  %s389_s13 = int_to_ptr.vmem [resolvable:$true] %s388_s13 }
  0x87   : > { %s3810_s25 = scalar_lea.hbm %s4602_s6, 4096 }
  0x88   : > { %p3811_p1 = scmp.ne.s32.totalorder %s4602_s6, %s3810_s25  ;;  %p3817_p0 = scmp.lt.u32.totalorder %s3810_s25, %s4602_s6 }
  0x8a   : > { %p3813_p3 = pnand %p3811_p1, %p4111_p8 }
  0x8c   : > { %p3814_p13 = pneg %p3813_p3 }
  0x8e   : > { %p3819_p2 = pnand %p3817_p0, %p3814_p13 }
  0x90   : > { %3822 = shalt.err (!%p3819_p2)
}
  0x91   : > { %s3823_s14 = scalar_lea.vmem %s376_s8, 4096  ;;  %p3831_p4 = scmp.lt.s32.totalorder %s376_s8, %s376_s8 }
  0x92   : > { %p3824_p5 = scmp.ne.s32.totalorder %s376_s8, %s3823_s14  ;;  %p3832_p10 = scmp.lt.s32.totalorder %s3823_s14, %s3823_s14 }
  0x94   : > { %p3826_p7 = pnand %p3824_p5, %p4111_p8  ;;  %p3833_p11 = por %p3832_p10, %p3831_p4 }
  0x96   : > { %p3827_p9 = pneg %p3826_p7 }
  0x98   : > { %p3834_p12 = pnand %p3833_p11, %p3827_p9 }
  0x9a   : > { %3837 = shalt.err (!%p3834_p12)
}
  0x9b   : > { %3206 = dma.hbm_to_vmem [thread:$0]  (!%p4095_p6), %s4602_s6, 4096, %s376_s8, [#allocation13], %s3983_s30, %s3983_s30, %s3984_s12  }
  0x9c   : > { %s3838_s21 = scalar_lea.hbm %s4603_s7, 4096 }
  0x9d   : > { %p3839_p1 = scmp.ne.s32.totalorder %s4603_s7, %s3838_s21  ;;  %p3845_p0 = scmp.lt.u32.totalorder %s3838_s21, %s4603_s7 }
  0x9f   : > { %p3841_p3 = pnand %p3839_p1, %p4111_p8 }
  0xa1   : > { %p3842_p13 = pneg %p3841_p3 }
  0xa3   : > { %p3847_p2 = pnand %p3845_p0, %p3842_p13 }
  0xa5   : > { %3850 = shalt.err (!%p3847_p2)
}
  0xa6   : > { %s3851_s11 = scalar_lea.vmem %s389_s13, 4096  ;;  %p3859_p4 = scmp.lt.s32.totalorder %s389_s13, %s389_s13 }
  0xa7   : > { %p3852_p5 = scmp.ne.s32.totalorder %s389_s13, %s3851_s11  ;;  %p3860_p10 = scmp.lt.s32.totalorder %s3851_s11, %s3851_s11 }
  0xa9   : > { %p3854_p7 = pnand %p3852_p5, %p4111_p8  ;;  %p3861_p11 = por %p3860_p10, %p3859_p4 }
  0xab   : > { %p3855_p9 = pneg %p3854_p7 }
  0xad   : > { %p3862_p12 = pnand %p3861_p11, %p3855_p9 }
  0xaf   : > { %3865 = shalt.err (!%p3862_p12)
}
  0xb0   : > { %3209 = dma.hbm_to_vmem [thread:$0]  (!%p4095_p6), %s4603_s7, 4096, %s389_s13, [#allocation16], %s3983_s30, %s3983_s30, %s3984_s12  }
  0xb1   : > { %s2851_s27 = sadd.s32 4294967294, %s3978_s20   ;;  %s4273_s16 = sadd.s32 1, %s3978_s20  }
  0xb2   : > { %s38_s29 = sadd.s32 1, %s3974_s19  ;;  %s35_s1 = ssub.s32 %s3978_s20, %s4273_s16 }
  0xb3   : > { %p45_p8 = scmp.ne.s32.totalorder %s3974_s19, %s3970_s18  ;;  %p36_p1 = scmp.eq.s32.totalorder %s35_s1, 0 }
  0xb4   : > { %p46_p3 = scmp.eq.s32.totalorder %s3978_s20, 0  ;;  %p51_p13 = scmp.ne.s32.totalorder %s3970_s18, %s3966_s17 }
  0xb5   : > { %p285_p0 = scmp.eq.s32.totalorder %s4079_s23, 1  ;;  %p4621_p5 = scmp.eq.s32.totalorder %s4079_s23, 0 }
  0xb6   : > { %s4285_s9 = scalar_select %p36_p1, %s3974_s19, %s38_s29  }
  0xb7   : > { %p47_p2 = por %p46_p3, %p45_p8  ;;  %p4289_p7 = por %p4621_p5, %p51_p13 }
  0xb8   : > { %p4293_p6 = por %p285_p0, %p45_p8  ;;  %p291_p9 = scmp.eq.s32.totalorder %s2851_s27, 1 }
  0xb9   : > { %p3225_p4 = scmp.lt.s32.totalorder %s3978_s20, 2  ;;  %s411_s12 = sand.u32 1, %s3974_s19  }
  0xba   : > { %s4623_s30 = scalar_select %p4293_p6, 1, 0 }
  0xbb   : > { %p4299_p10 = por %p291_p9, %p51_p13  ;;  %s2861_s21 = sshll.u32 %s411_s12, 5 }
  0xbc   : > { %s3114_s25 = sshll.u32 %s3978_s20, 9  ;;  %s415_s11 = scalar_lea.vmem [#allocation3], %s2861_s21 }
  0xbd   : > { %s4624_s13 = scalar_select %p4299_p10, 1, 0 }
  0xbe   : > { %s4307_s22 = scalar_lea.hbm %s4596_s0, %s3114_s25  ;;  %s422_s8 = sshll.u32 %s415_s11, 4  ;;  %s4313_s8 = int_to_ptr.vmem [resolvable:$true] %s422_s8 }
  0xbf   : > { %p4309_p11 = pnand %p3225_p4, %p47_p2  ;;  %s4315_s27 = scalar_lea.sflag [#allocation4], %s411_s12 }
  0xc0   : > { %s3866_s29 = scalar_lea.hbm %s4307_s22, 512  ;;  %s3871_s25 = scalar_lea.hbm %s4596_s0, 1024 }
  0xc1   : > { %p3867_p12 = scmp.ne.s32.totalorder %s4307_s22, %s3866_s29  ;;  %p3868_p8 = pneg %p4309_p11 }
  0xc2   : > { %p3872_p13 = scmp.lt.u32.totalorder %s4307_s22, %s4596_s0  ;;  %p3873_p0 = scmp.lt.u32.totalorder %s3871_s25, %s3866_s29 }
  0xc3   : > { %p3869_p1 = pnand %p3868_p8, %p3867_p12  ;;  %p3875_p5 = scmp.lt.u32.totalorder %s3866_s29, %s4307_s22 }
  0xc4   : > { %p3874_p2 = por %p3873_p0, %p3872_p13 }
  0xc5   : > { %p3870_p3 = pneg %p3869_p1 }
  0xc6   : > { %p3876_p9 = por %p3875_p5, %p3874_p2 }
  0xc8   : > { %p3877_p4 = pnand %p3876_p9, %p3870_p3 }
  0xca   : > { %3880 = shalt.err (!%p3877_p4)
}
  0xcb   : > { %s3881_s12 = scalar_lea.vmem %s4313_s8, 512  ;;  %s3989_s11 = smov [#allocation3]  }
  0xcc   : > { %p3882_p12 = scmp.ne.s32.totalorder %s4313_s8, %s3881_s12  ;;  %s3886_s1 = sshll.u32 %s3989_s11, 4  ;;  %s3887_s1 = int_to_ptr.vmem [resolvable:$false] %s3886_s1 }
  0xcd   : > { %s3888_s21 = scalar_lea.vmem %s3887_s1, 1024  ;;  %p3889_p6 = scmp.lt.s32.totalorder %s4313_s8, %s3887_s1 }
  0xce   : > { %p3884_p1 = pnand %p3882_p12, %p3868_p8  ;;  %p3890_p13 = scmp.lt.s32.totalorder %s3888_s21, %s3881_s12 }
  0xd0   : > { %p3885_p10 = pneg %p3884_p1  ;;  %p3891_p0 = por %p3890_p13, %p3889_p6 }
  0xd2   : > { %p3892_p2 = pnand %p3891_p0, %p3885_p10 }
  0xd4   : > { %3895 = shalt.err (!%p3892_p2)
}
  0xd5   : > { %s3990_s29 = smov 256   ;;  %s3991_s25 = smov 16  }
  0xd6   : > { %3213 = dma.hbm_to_vmem [thread:$0]  (!%p4309_p11), %s4307_s22, 512, %s4313_s8, %s4315_s27, %s3990_s29, %s3990_s29, %s3991_s25  }
  0xd7   : > { %p4626_p8 = scmp.ne.s32.totalorder %s4617_s24, 0 }
  0xd8   : > { %s4346_s28 = sand.u32 (!%p4626_p8), 1, %s3970_s18  }
  0xd9   : > { %434 = sbr.rel (%p4626_p8) target bundleno = 3335 (0xd07), region = 64  ;;  %s2865_s26 = sshll.u32 (!%p4626_p8), %s4346_s28, 5 }
  0xda   : > { %s437_s12 = scalar_lea.sflag (!%p4626_p8), [#allocation4], %s4346_s28  ;;  %s4352_s11 = scalar_lea.vmem (!%p4626_p8), [#allocation3], %s2865_s26 }
  0xe0   : > { %3941 = dma.done.wait (%p4289_p7), %s437_s12, 512  }
  0xe1   : > { %3943 = vsyncadd (%p4289_p7), %s437_s12, 4294966784  ;;  %p4627_p6 = scmp.eq.s32.totalorder %s4079_s23, 0 }
  0xe3   : > { %3945 = dma.done.wait (%p4627_p6), [#allocation7], 8192   ;;  %p4628_p10 = pmov %p4627_p6 }
  0xe4   : > { %p4629_p11 = pmov %p4627_p6 }
  0xe5   : > { %3947 = vsyncadd (%p4628_p10), [#allocation7], 4294959104 }
  0xe6   : > { %3949 = dma.done.wait (%p4629_p11), [#allocation10], 8192   ;;  %p4630_p3 = pmov %p4627_p6 }
  0xe8   : > { %3951 = vsyncadd (%p4630_p3), [#allocation10], 4294959104  ;;  %p4631_p5 = pmov %p4630_p3 }
  0xe9   : > { %p4632_p9 = pmov %p4630_p3 }
  0xea   : > { %3953 = dma.done.wait (%p4631_p5), [#allocation13], 8192  }
  0xeb   : > { %3955 = vsyncadd (%p4632_p9), [#allocation13], 4294959104  ;;  %p4633_p7 = pmov %p4630_p3 }
  0xec   : > { %p4634_p4 = pmov %p4630_p3 }
  0xed   : > { %3957 = dma.done.wait (%p4633_p7), [#allocation16], 4096  }
  0xee   : > { %3959 = vsyncadd (%p4634_p4), [#allocation16], 4294963200  ;;  %v4375_v0 = vld [vmem:[%s4352_s11] sm:$0xff]  ;;  %v4378_v1 = vld [vmem:[%s4352_s11 + $0x8] sm:$0xff]  ;;  %vm3993_vm0 = vmmov 0   ;;  %s4635_s14 = sld [smem:[#allocation25_spill]] }
  0xef   : > { %v4381_v2 = vld [vmem:[%s4352_s11 + $0x10] sm:$0xff]  ;;  %v519_v3 = vmul.f32 %v4375_v0, %v4375_v0  ;;  %v520_v4 = vmul.f32 %v4378_v1, %v4378_v1  ;;  %v4388_v5 = vld [vmem:[%s4352_s11 + $0x18] sm:$0xff]  ;;  %v3282_v8 = vld [vmem:[#allocation6 + $0x4] ss:$8 sps:$4 sm:$0xff]   ;;  %vm1351_vm1 = vcmask 130048   ;;  %s4636_s24 = sld [smem:[#allocation26_spill]] }
  0xf0   : > { %v521_v6 = vmul.f32 %v4381_v2, %v4381_v2  ;;  %v522_v7 = vmul.f32 %v4388_v5, %v4388_v5  ;;  %v3284_v9 = vld [vmem:[#allocation6] ss:$8 sps:$4 sm:$0xff]   ;;  %v3285_v11 = vld [vmem:[#allocation8 + $0x4] ss:$8 sps:$4 sm:$0xff]   ;;  %761 = vmatprep.subr.bf16.mxu0 %v3282_v8  ;;  %v3288_v13 = vld [vmem:[#allocation6 + $0x14] ss:$8 sps:$4 sm:$0xff]  }
  0xf1   : > { %v523_v10 = vadd.f32 %v520_v4, %v519_v3  ;;  %v3287_v12 = vld [vmem:[#allocation8] ss:$8 sps:$4 sm:$0xff]   ;;  %762 = vmatpush1.bf16.msra.mxu0 %v3284_v9  ;;  %v3290_v15 = vld [vmem:[#allocation6 + $0x10] ss:$8 sps:$4 sm:$0xff]   ;;  %1015 = vmatprep.subr.bf16.mxu1 %v3285_v11  ;;  %v3291_v16 = vld [vmem:[#allocation8 + $0x14] ss:$8 sps:$4 sm:$0xff]  }
  0xf2   : > { %v526_v14 = vadd.f32 %v522_v7, %v521_v6  ;;  %763 = vmatprep.subr.bf16.mxu0 %v3288_v13  ;;  %1016 = vmatpush1.bf16.msra.mxu1 %v3287_v12  ;;  %v3293_v17 = vld [vmem:[#allocation8 + $0x10] ss:$8 sps:$4 sm:$0xff]   ;;  %v3294_v18 = vld [vmem:[#allocation6 + $0x24] ss:$8 sps:$4 sm:$0xff]   ;;  %v3296_v20 = vld [vmem:[#allocation6 + $0x20] ss:$8 sps:$4 sm:$0xff]  }
  0xf3   : > { %524 = vadd.xlane.f32.xlu0 %v523_v10  ;;  %1017 = vmatprep.subr.bf16.mxu1 %v3291_v16  ;;  %v3297_v19 = vld [vmem:[#allocation8 + $0x24] ss:$8 sps:$4 sm:$0xff]   ;;  %v3300_v21 = vld [vmem:[#allocation6 + $0x34] ss:$8 sps:$4 sm:$0xff]   ;;  %v3299_v22 = vld [vmem:[#allocation8 + $0x20] ss:$8 sps:$4 sm:$0xff]  }
  0xf4   : > { %v3303_v23 = vld [vmem:[#allocation8 + $0x34] ss:$8 sps:$4 sm:$0xff]   ;;  %v3302_v24 = vld [vmem:[#allocation6 + $0x30] ss:$8 sps:$4 sm:$0xff]   ;;  %v3306_v25 = vld [vmem:[#allocation6 + $0x44] ss:$8 sps:$4 sm:$0xff]  }
  0xf5   : > { %764 = vmatpush1.bf16.msra.mxu0 %v3290_v15  ;;  %v3305_v26 = vld [vmem:[#allocation8 + $0x30] ss:$8 sps:$4 sm:$0xff]   ;;  %v3309_v27 = vld [vmem:[#allocation8 + $0x44] ss:$8 sps:$4 sm:$0xff]   ;;  %v3308_v28 = vld [vmem:[#allocation6 + $0x40] ss:$8 sps:$4 sm:$0xff]  }
  0xf6   : > { %765 = vmatprep.subr.bf16.mxu0 %v3294_v18  ;;  %1018 = vmatpush1.bf16.msra.mxu1 %v3293_v17  ;;  %v3312_v29 = vld [vmem:[#allocation6 + $0x54] ss:$8 sps:$4 sm:$0xff]   ;;  %v3311_v30 = vld [vmem:[#allocation8 + $0x40] ss:$8 sps:$4 sm:$0xff]   ;;  %v3314_v32 = vld [vmem:[#allocation6 + $0x50] ss:$8 sps:$4 sm:$0xff]  }
  0xf7   : > { %527 = vadd.xlane.f32.xlu0 %v526_v14  ;;  %1019 = vmatprep.subr.bf16.mxu1 %v3297_v19  ;;  %v3315_v31 = vld [vmem:[#allocation8 + $0x54] ss:$8 sps:$4 sm:$0xff]   ;;  %v3318_v33 = vld [vmem:[#allocation6 + $0x64] ss:$8 sps:$4 sm:$0xff]   ;;  %v3317_v34 = vld [vmem:[#allocation8 + $0x50] ss:$8 sps:$4 sm:$0xff]  }
  0xf8   : > { %v3321_v35 = vld [vmem:[#allocation8 + $0x64] ss:$8 sps:$4 sm:$0xff]   ;;  %v3320_v36 = vld [vmem:[#allocation6 + $0x60] ss:$8 sps:$4 sm:$0xff]   ;;  %v3324_v37 = vld [vmem:[#allocation6 + $0x74] ss:$8 sps:$4 sm:$0xff]  }
  0xf9   : > { %766 = vmatpush1.bf16.msra.mxu0 %v3296_v20  ;;  %v3323_v38 = vld [vmem:[#allocation8 + $0x60] ss:$8 sps:$4 sm:$0xff]   ;;  %v3327_v39 = vld [vmem:[#allocation8 + $0x74] ss:$8 sps:$4 sm:$0xff]   ;;  %v3326_v40 = vld [vmem:[#allocation6 + $0x70] ss:$8 sps:$4 sm:$0xff]   ;;  %v541_v20 = vlaneseq }
  0xfa   : > { %767 = vmatprep.subr.bf16.mxu0 %v3300_v21  ;;  %1020 = vmatpush1.bf16.msra.mxu1 %v3299_v22  ;;  %v3330_v41 = vld [vmem:[#allocation6 + $0x84] ss:$8 sps:$4 sm:$0xff]   ;;  %v3329_v42 = vld [vmem:[#allocation8 + $0x70] ss:$8 sps:$4 sm:$0xff]   ;;  %v3332_v44 = vld [vmem:[#allocation6 + $0x80] ss:$8 sps:$4 sm:$0xff]  }
  0xfb   : > { %1021 = vmatprep.subr.bf16.mxu1 %v3303_v23  ;;  %v3333_v43 = vld [vmem:[#allocation8 + $0x84] ss:$8 sps:$4 sm:$0xff]   ;;  %v3336_v45 = vld [vmem:[#allocation6 + $0x94] ss:$8 sps:$4 sm:$0xff]   ;;  %v3335_v46 = vld [vmem:[#allocation8 + $0x80] ss:$8 sps:$4 sm:$0xff]  }
  0xfc   : > { %v3339_v47 = vld [vmem:[#allocation8 + $0x94] ss:$8 sps:$4 sm:$0xff]   ;;  %v3338_v48 = vld [vmem:[#allocation6 + $0x90] ss:$8 sps:$4 sm:$0xff]   ;;  %v3342_v49 = vld [vmem:[#allocation6 + $0xa4] ss:$8 sps:$4 sm:$0xff]  }
  0xfd   : > { %768 = vmatpush1.bf16.msra.mxu0 %v3302_v24  ;;  %v3341_v50 = vld [vmem:[#allocation8 + $0x90] ss:$8 sps:$4 sm:$0xff]   ;;  %v3345_v51 = vld [vmem:[#allocation8 + $0xa4] ss:$8 sps:$4 sm:$0xff]   ;;  %v3344_v52 = vld [vmem:[#allocation6 + $0xa0] ss:$8 sps:$4 sm:$0xff]  }
  0xfe   : > { %769 = vmatprep.subr.bf16.mxu0 %v3306_v25  ;;  %1022 = vmatpush1.bf16.msra.mxu1 %v3305_v26  ;;  %v3348_v53 = vld [vmem:[#allocation6 + $0xb4] ss:$8 sps:$4 sm:$0xff]   ;;  %v3347_v54 = vld [vmem:[#allocation8 + $0xa0] ss:$8 sps:$4 sm:$0xff]   ;;  %v3350_v56 = vld [vmem:[#allocation6 + $0xb0] ss:$8 sps:$4 sm:$0xff]  }
  0xff   : > { %1023 = vmatprep.subr.bf16.mxu1 %v3309_v27  ;;  %v3351_v55 = vld [vmem:[#allocation8 + $0xb4] ss:$8 sps:$4 sm:$0xff]   ;;  %v3353_v57 = vld [vmem:[#allocation8 + $0xb0] ss:$8 sps:$4 sm:$0xff]   ;;  %v3354_v58 = vld [vmem:[#allocation6 + $0xc4] ss:$8 sps:$4 sm:$0xff]  }
 0x100   : > { %v3357_v59 = vld [vmem:[#allocation8 + $0xc4] ss:$8 sps:$4 sm:$0xff]   ;;  %v3356_v60 = vld [vmem:[#allocation6 + $0xc0] ss:$8 sps:$4 sm:$0xff]   ;;  %v3360_v62 = vld [vmem:[#allocation6 + $0xd4] ss:$8 sps:$4 sm:$0xff]  }
 0x101   : > { %770 = vmatpush1.bf16.msra.mxu0 %v3308_v28  ;;  %v3359_v61 = vld [vmem:[#allocation8 + $0xc0] ss:$8 sps:$4 sm:$0xff]   ;;  %v3363_v63 = vld [vmem:[#allocation8 + $0xd4] ss:$8 sps:$4 sm:$0xff]   ;;  %v3362_v3 = vld [vmem:[#allocation6 + $0xd0] ss:$8 sps:$4 sm:$0xff]  }
 0x102   : > { %771 = vmatprep.subr.bf16.mxu0 %v3312_v29  ;;  %1024 = vmatpush1.bf16.msra.mxu1 %v3311_v30  ;;  %v3365_v4 = vld [vmem:[#allocation8 + $0xd0] ss:$8 sps:$4 sm:$0xff]   ;;  %v3366_v6 = vld [vmem:[#allocation6 + $0xe4] ss:$8 sps:$4 sm:$0xff]   ;;  %v3368_v8 = vld [vmem:[#allocation6 + $0xe0] ss:$8 sps:$4 sm:$0xff]  }
 0x103   : > { %1025 = vmatprep.subr.bf16.mxu1 %v3315_v31  ;;  %v3369_v7 = vld [vmem:[#allocation8 + $0xe4] ss:$8 sps:$4 sm:$0xff]   ;;  %v3371_v9 = vld [vmem:[#allocation8 + $0xe0] ss:$8 sps:$4 sm:$0xff]   ;;  %v3372_v10 = vld [vmem:[#allocation6 + $0xf4] ss:$8 sps:$4 sm:$0xff]  }
 0x104   : > { %v3375_v11 = vld [vmem:[#allocation8 + $0xf4] ss:$8 sps:$4 sm:$0xff]   ;;  %v3374_v12 = vld [vmem:[#allocation6 + $0xf0] ss:$8 sps:$4 sm:$0xff]   ;;  %v3380_v14 = vld [vmem:[#allocation9 + $0x4] ss:$8 sps:$4 sm:$0xff]  }
 0x105   : > { %772 = vmatpush1.bf16.msra.mxu0 %v3314_v32  ;;  %v3377_v13 = vld [vmem:[#allocation8 + $0xf0] ss:$8 sps:$4 sm:$0xff]   ;;  %v542_v22 = vshrl.u32 %v541_v20, 7  ;;  %v512_v26 = vld [vmem:[%s4606_s10] ss:$4 sm:$0x3] }
 0x106   : > { %773 = vmatprep.subr.bf16.mxu0 %v3318_v33  ;;  %1026 = vmatpush1.bf16.msra.mxu1 %v3317_v34  ;;  %s3115_s21 = sshll.u32 %s4079_s23, 9  ;;  %s506_s29 = scalar_lea.vmem [#allocation17], %s2865_s26 }
 0x107   : > { %1027 = vmatprep.subr.bf16.mxu1 %v3321_v35  ;;  %v4394_v23 = vsub.s32 1, %v542_v22  ;;  %v4396_v24 = vsub.s32 0, %v542_v22  ;;  %s2711_s25 = sshll.u32 %s506_s29, 4  ;;  %s2698_s23 = scalar_lea.sflag [#allocation5], %s4346_s28  ;;  %s4552_s25 = int_to_ptr.vmem [resolvable:$true] %s2711_s25 }
 0x108   : > { %s3896_s26 = scalar_lea.vmem %s4552_s25, 512  ;;  %p4638_p1 = scmp.ne.s32.totalorder %s4623_s30, 0 }
 0x109   : > { %774 = vmatpush1.bf16.msra.mxu0 %v3320_v36  ;;  %v548_v28 = vrot.slane %v512_v26, %v4394_v23  ;;  %v544_v30 = vrot.slane %v512_v26, %v4396_v24  ;;  %p3897_p12 = scmp.ne.s32.totalorder %s4552_s25, %s3896_s26  ;;  %s3995_s22 = smov [#allocation17]  }
 0x10a   : > { %775 = vmatprep.subr.bf16.mxu0 %v3324_v37  ;;  %1028 = vmatpush1.bf16.msra.mxu1 %v3323_v38  ;;  %s3900_s8 = sshll.u32 %s3995_s22, 4  ;;  %s3901_s8 = int_to_ptr.vmem [resolvable:$false] %s3900_s8 }
 0x10b   : > { %1029 = vmatprep.subr.bf16.mxu1 %v3327_v39  ;;  %v3378_v39 = vld [vmem:[#allocation9] ss:$8 sps:$4 sm:$0xff]   ;;  %p3898_p13 = pnand %p3897_p12, %p4638_p1  ;;  %s3902_s27 = scalar_lea.vmem %s3901_s8, 1024 }
 0x10c   : > { %p3903_p2 = scmp.lt.s32.totalorder %s4552_s25, %s3901_s8  ;;  %p3904_p8 = scmp.lt.s32.totalorder %s3902_s27, %s3896_s26 }
 0x10d   : > { %776 = vmatpush1.bf16.msra.mxu0 %v3326_v40  ;;  %p3899_p0 = pneg %p3898_p13 }
 0x10e   : > { %777 = vmatprep.subr.bf16.mxu0 %v3330_v41  ;;  %1030 = vmatpush1.bf16.msra.mxu1 %v3329_v42  ;;  %v3389_v41 = vld [vmem:[#allocation9 + $0x34] ss:$8 sps:$4 sm:$0xff]   ;;  %v3387_v42 = vld [vmem:[#allocation9 + $0x30] ss:$8 sps:$4 sm:$0xff]   ;;  %p3905_p6 = por %p3904_p8, %p3903_p2 }
 0x10f   : > { %1031 = vmatprep.subr.bf16.mxu1 %v3333_v43  ;;  %v3392_v43 = vld [vmem:[#allocation9 + $0x44] ss:$8 sps:$4 sm:$0xff]  }
 0x110   : > { %p3906_p10 = pnand %p3905_p6, %p3899_p0 }
 0x111   : > { %778 = vmatpush1.bf16.msra.mxu0 %v3332_v44  ;;  %v3390_v44 = vld [vmem:[#allocation9 + $0x40] ss:$8 sps:$4 sm:$0xff]  }
 0x112   : > { %779 = vmatprep.subr.bf16.mxu0 %v3336_v45  ;;  %1032 = vmatpush1.bf16.msra.mxu1 %v3335_v46  ;;  %v3395_v45 = vld [vmem:[#allocation9 + $0x54] ss:$8 sps:$4 sm:$0xff]   ;;  %v3393_v46 = vld [vmem:[#allocation9 + $0x50] ss:$8 sps:$4 sm:$0xff]  }
 0x113   : > { %1033 = vmatprep.subr.bf16.mxu1 %v3339_v47  ;;  %v3398_v47 = vld [vmem:[#allocation9 + $0x64] ss:$8 sps:$4 sm:$0xff]  }
 0x115   : > { %780 = vmatpush1.bf16.msra.mxu0 %v3338_v48  ;;  %v3396_v48 = vld [vmem:[#allocation9 + $0x60] ss:$8 sps:$4 sm:$0xff]  }
 0x116   : > { %781 = vmatprep.subr.bf16.mxu0 %v3342_v49  ;;  %1034 = vmatpush1.bf16.msra.mxu1 %v3341_v50  ;;  %v3401_v49 = vld [vmem:[#allocation9 + $0x74] ss:$8 sps:$4 sm:$0xff]   ;;  %v3399_v50 = vld [vmem:[#allocation9 + $0x70] ss:$8 sps:$4 sm:$0xff]  }
 0x117   : > { %1035 = vmatprep.subr.bf16.mxu1 %v3345_v51  ;;  %v3404_v51 = vld [vmem:[#allocation9 + $0x84] ss:$8 sps:$4 sm:$0xff]  }
 0x119   : > { %782 = vmatpush1.bf16.msra.mxu0 %v3344_v52  ;;  %v3402_v52 = vld [vmem:[#allocation9 + $0x80] ss:$8 sps:$4 sm:$0xff]  }
 0x11a   : > { %783 = vmatprep.subr.bf16.mxu0 %v3348_v53  ;;  %1036 = vmatpush1.bf16.msra.mxu1 %v3347_v54  ;;  %v3407_v53 = vld [vmem:[#allocation9 + $0x94] ss:$8 sps:$4 sm:$0xff]   ;;  %v3405_v54 = vld [vmem:[#allocation9 + $0x90] ss:$8 sps:$4 sm:$0xff]  }
 0x11b   : > { %1037 = vmatprep.subr.bf16.mxu1 %v3351_v55  ;;  %v3410_v55 = vld [vmem:[#allocation9 + $0xa4] ss:$8 sps:$4 sm:$0xff]  }
 0x11d   : > { %784 = vmatpush1.bf16.msra.mxu0 %v3350_v56  ;;  %v3408_v56 = vld [vmem:[#allocation9 + $0xa0] ss:$8 sps:$4 sm:$0xff]  }
 0x11e   : > { %785 = vmatprep.subr.bf16.mxu0 %v3354_v58  ;;  %1038 = vmatpush1.bf16.msra.mxu1 %v3353_v57  ;;  %v3413_v57 = vld [vmem:[#allocation9 + $0xb4] ss:$8 sps:$4 sm:$0xff]   ;;  %v3411_v58 = vld [vmem:[#allocation9 + $0xb0] ss:$8 sps:$4 sm:$0xff]  }
 0x11f   : > { %1039 = vmatprep.subr.bf16.mxu1 %v3357_v59  ;;  %v3416_v59 = vld [vmem:[#allocation9 + $0xc4] ss:$8 sps:$4 sm:$0xff]  }
 0x121   : > { %786 = vmatpush1.bf16.msra.mxu0 %v3356_v60  ;;  %v3414_v60 = vld [vmem:[#allocation9 + $0xc0] ss:$8 sps:$4 sm:$0xff]  }
 0x122   : > { %787 = vmatprep.subr.bf16.mxu0 %v3360_v62  ;;  %1040 = vmatpush1.bf16.msra.mxu1 %v3359_v61  ;;  %v3419_v61 = vld [vmem:[#allocation9 + $0xd4] ss:$8 sps:$4 sm:$0xff]   ;;  %v3417_v62 = vld [vmem:[#allocation9 + $0xd0] ss:$8 sps:$4 sm:$0xff]  }
 0x123   : > { %1041 = vmatprep.subr.bf16.mxu1 %v3363_v63  ;;  %v3422_v63 = vld [vmem:[#allocation9 + $0xe4] ss:$8 sps:$4 sm:$0xff]  }
 0x125   : > { %788 = vmatpush1.bf16.msra.mxu0 %v3362_v3  ;;  %v3420_v3 = vld [vmem:[#allocation9 + $0xe0] ss:$8 sps:$4 sm:$0xff]  }
 0x126   : > { %789 = vmatprep.subr.bf16.mxu0 %v3366_v6  ;;  %1042 = vmatpush1.bf16.msra.mxu1 %v3365_v4  ;;  %v3425_v4 = vld [vmem:[#allocation9 + $0xf4] ss:$8 sps:$4 sm:$0xff]   ;;  %v3423_v6 = vld [vmem:[#allocation9 + $0xf0] ss:$8 sps:$4 sm:$0xff]  }
 0x127   : > { %1043 = vmatprep.subr.bf16.mxu1 %v3369_v7  ;;  %v3992_v7 = vmov 0.0  }
 0x129   : > { %790 = vmatpush1.bf16.msra.mxu0 %v3368_v8  ;;  %v589_v8 = vld [vmem:[%s4635_s14] ss:$4 sm:$0x3] }
 0x12a   : > { %791 = vmatprep.subr.bf16.mxu0 %v3372_v10  ;;  %1044 = vmatpush1.bf16.msra.mxu1 %v3371_v9  ;;  %v2909_v9 = vld [vmem:[%s4635_s14 + $0x1] ss:$4 sm:$0x3]  ;;  %v594_v10 = vrot.slane %v589_v8, %v4396_v24 }
 0x12b   : > { %1045 = vmatprep.subr.bf16.mxu1 %v3375_v11  ;;  %v598_v11 = vrot.slane %v589_v8, %v4394_v23 }
 0x12d   : > { %792 = vmatpush1.bf16.msra.mxu0 %v3374_v12  ;;  %v852_v12 = vrot.slane %v2909_v9, %v4394_v23 }
 0x12e   : > { %1265 = vmatprep.subr.bf16.mxu0 %v3380_v14  ;;  %1046 = vmatpush1.bf16.msra.mxu1 %v3377_v13  ;;  %v848_v13 = vrot.slane %v2909_v9, %v4396_v24 }
 0x12f   : > { %3124 = vmatprep.subr.bf16.mxu1 %v3992_v7 }
 0x180   : > { %v525_v15 = vpop.xlane.xlu0 %524 }
 0x181   : > { %v530_v16 = vmul.f32 0.00390625, %v525_v15 }
 0x183   : > { %v532_v17 = vadd.f32 1e-06, %v530_v16 }
 0x184   : > { %v528_v18 = vpop.xlane.xlu0 %527 }
 0x185   : > { %3618 = vrsqrt.f32 %v532_v17  ;;  %v531_v19 = vmul.f32 0.00390625, %v528_v18 }
 0x187   : > { %v533_v21 = vadd.f32 1e-06, %v531_v19 }
 0x189   : > { %3620 = vrsqrt.f32 %v533_v21 }
 0x18f   : > { %v3619_v25 = vpop.eup %3618 }
 0x190   : > { %v537_v27 = vmul.f32 %v3619_v25, %v4378_v1  ;;  %v536_v29 = vmul.f32 %v3619_v25, %v4375_v0  ;;  %v3383_v1 = vld [vmem:[#allocation9 + $0x14] ss:$8 sps:$4 sm:$0xff]   ;;  %v3381_v0 = vld [vmem:[#allocation9 + $0x10] ss:$8 sps:$4 sm:$0xff]  }
 0x192   : > { %v552_v34 = vmul.f32 %v548_v28, %v537_v27  ;;  %v551_v36 = vmul.f32 %v544_v30, %v536_v29 }
 0x193   : > { %v3621_v31 = vpop.eup %3620 }
 0x194   : > { %v539_v32 = vmul.f32 %v3621_v31, %v4388_v5  ;;  %v538_v33 = vmul.f32 %v3621_v31, %v4381_v2  ;;  %v3386_v2 = vld [vmem:[#allocation9 + $0x24] ss:$8 sps:$4 sm:$0xff]   ;;  %v3384_v5 = vld [vmem:[#allocation9 + $0x20] ss:$8 sps:$4 sm:$0xff]  }
 0x196   : > { %v554_v35 = vmul.f32 %v548_v28, %v539_v32  ;;  %v553_v37 = vmul.f32 %v544_v30, %v538_v33 }
 0x198   : > { %v556_v38 = vpack.c.bf16 %v554_v35, %v552_v34  ;;  %v4407_v40 = vpack.c.bf16 %v553_v37, %v551_v36 }
 0x19a   : > { %793 = vmatprep.mubr.bf16.mxu0 %v556_v38  ;;  %1047 = vmatprep.mubr.bf16.mxu1 %v556_v38 }
 0x19b   : > { %794 = vmatmul.mubr.bf16.vlgmr.msra.gmra.mrb[0].mxu0 %v4407_v40  ;;  %1048 = vmatmul.mubr.bf16.vlgmr.msra.gmra.mrb[0].mxu1 %v4407_v40 }
 0x19c   : > { %1266 = vmatpush1.bf16.msra.mxu0 %v3378_v39  ;;  %1297 = vmatprep.mubr.bf16.mxu0 %v556_v38 }
 0x19d   : > { %1267 = vmatprep.subr.bf16.mxu0 %v3383_v1  ;;  %3126 = vmatprep.mubr.msk.bf16.mxu1 %vm3993_vm0, %v3992_v7 }
 0x1a0   : > { %1268 = vmatpush1.bf16.msra.mxu0 %v3381_v0 }
 0x1a1   : > { %1269 = vmatprep.subr.bf16.mxu0 %v3386_v2 }
 0x1a4   : > { %1270 = vmatpush1.bf16.msra.mxu0 %v3384_v5 }
 0x1a5   : > { %1271 = vmatprep.subr.bf16.mxu0 %v3389_v41 }
 0x1a8   : > { %1272 = vmatpush1.bf16.msra.mxu0 %v3387_v42 }
 0x1a9   : > { %1273 = vmatprep.subr.bf16.mxu0 %v3392_v43 }
 0x1ac   : > { %1274 = vmatpush1.bf16.msra.mxu0 %v3390_v44 }
 0x1ad   : > { %1275 = vmatprep.subr.bf16.mxu0 %v3395_v45 }
 0x1b0   : > { %1276 = vmatpush1.bf16.msra.mxu0 %v3393_v46 }
 0x1b1   : > { %1277 = vmatprep.subr.bf16.mxu0 %v3398_v47 }
 0x1b4   : > { %1278 = vmatpush1.bf16.msra.mxu0 %v3396_v48 }
 0x1b5   : > { %1279 = vmatprep.subr.bf16.mxu0 %v3401_v49 }
 0x1b8   : > { %1280 = vmatpush1.bf16.msra.mxu0 %v3399_v50 }
 0x1b9   : > { %1281 = vmatprep.subr.bf16.mxu0 %v3404_v51 }
 0x1bc   : > { %1282 = vmatpush1.bf16.msra.mxu0 %v3402_v52 }
 0x1bd   : > { %1283 = vmatprep.subr.bf16.mxu0 %v3407_v53 }
 0x1c0   : > { %1284 = vmatpush1.bf16.msra.mxu0 %v3405_v54 }
 0x1c1   : > { %1285 = vmatprep.subr.bf16.mxu0 %v3410_v55 }
 0x1c4   : > { %1286 = vmatpush1.bf16.msra.mxu0 %v3408_v56 }
 0x1c5   : > { %1287 = vmatprep.subr.bf16.mxu0 %v3413_v57 }
 0x1c8   : > { %1288 = vmatpush1.bf16.msra.mxu0 %v3411_v58 }
 0x1c9   : > { %1289 = vmatprep.subr.bf16.mxu0 %v3416_v59 }
 0x1cc   : > { %1290 = vmatpush1.bf16.msra.mxu0 %v3414_v60 }
 0x1cd   : > { %1291 = vmatprep.subr.bf16.mxu0 %v3419_v61 }
 0x1d0   : > { %1292 = vmatpush1.bf16.msra.mxu0 %v3417_v62 }
 0x1d1   : > { %1293 = vmatprep.subr.bf16.mxu0 %v3422_v63 }
 0x1d4   : > { %1294 = vmatpush1.bf16.msra.mxu0 %v3420_v3 }
 0x1d5   : > { %1295 = vmatprep.subr.bf16.mxu0 %v3425_v4  ;;  %v3428_v4 = vld [vmem:[#allocation11 + $0x4] ss:$8 sps:$4 sm:$0xff]  }
 0x1d8   : > { %1296 = vmatpush1.bf16.msra.mxu0 %v3423_v6 }
 0x1db   : > { %1298 = vmatmul.mubr.bf16.vlgmr.msra.gmra.mrb[4].mxu0 %v4407_v40  ;;  %v2942_v40 = vld [vmem:[%s4635_s14 + $0x2] ss:$4 sm:$0x3] }
 0x1dc   : > { %v1102_v1 = vrot.slane %v2942_v40, %v4394_v23  ;;  %v1098_v0 = vrot.slane %v2942_v40, %v4396_v24 }
 0x26e   : > { %v795_v14 = vpop.f32.mrb[0].mxu0  ;;  %v1049_v15 = vpop.f32.mrb[0].mxu1 }
 0x26f   : > { %v796_v16 = vadd.f32 %v795_v14, %v594_v10  ;;  %v797_v17 = vpop.f32.mrb[1].mxu0  ;;  %v1051_v18 = vpop.f32.mrb[1].mxu1  ;;  %v1050_v25 = vadd.f32 %v1049_v15, %v848_v13  ;;  %v3431_v15 = vld [vmem:[#allocation11 + $0x14] ss:$8 sps:$4 sm:$0xff]  }
 0x270   : > { %v798_v19 = vadd.f32 %v797_v17, %v598_v11  ;;  %v4425_v20 = vadd.f32 %v1051_v18, %v852_v12  ;;  %v799_v21 = vpop.f32.mrb[2].mxu0  ;;  %v1053_v22 = vpop.f32.mrb[2].mxu1  ;;  %v3434_v17 = vld [vmem:[#allocation11 + $0x24] ss:$8 sps:$4 sm:$0xff]   ;;  %v3432_v18 = vld [vmem:[#allocation11 + $0x20] ss:$8 sps:$4 sm:$0xff]  }
 0x271   : > { %v800_v26 = vadd.f32 %v799_v21, %v594_v10  ;;  %v1054_v27 = vadd.f32 %v1053_v22, %v848_v13  ;;  %v801_v28 = vpop.f32.mrb[3].mxu0  ;;  %v1055_v29 = vpop.f32.mrb[3].mxu1  ;;  %v804_v32 = vmul.f32 0.088388346, %v796_v16  ;;  %v3426_v13 = vld [vmem:[#allocation11] ss:$8 sps:$4 sm:$0xff]  }
 0x272   : > { %v802_v30 = vadd.f32 %v801_v28, %v598_v11  ;;  %v4427_v31 = vadd.f32 %v1055_v29, %v852_v12  ;;  %v4429_v35 = vmul.f32 0.088388346, %v798_v19  ;;  %v3429_v16 = vld [vmem:[#allocation11 + $0x10] ss:$8 sps:$4 sm:$0xff]   ;;  %v3437_v19 = vld [vmem:[#allocation11 + $0x34] ss:$8 sps:$4 sm:$0xff]  }
 0x273   : > { %v806_v33 = vmul.f32 0.088388346, %v800_v26  ;;  %v1058_v34 = vpack.c.bf16 %v1054_v27, %v1050_v25  ;;  %v3435_v21 = vld [vmem:[#allocation11 + $0x30] ss:$8 sps:$4 sm:$0xff]   ;;  %v3440_v22 = vld [vmem:[#allocation11 + $0x44] ss:$8 sps:$4 sm:$0xff]  }
 0x274   : > { %v4431_v36 = vmul.f32 0.088388346, %v802_v30  ;;  %v1059_v37 = vpack.c.bf16 %v4427_v31, %v4425_v20  ;;  %v3438_v25 = vld [vmem:[#allocation11 + $0x40] ss:$8 sps:$4 sm:$0xff]   ;;  %v3443_v26 = vld [vmem:[#allocation11 + $0x54] ss:$8 sps:$4 sm:$0xff]  }
 0x275   : > { %v808_v38 = vpack.c.bf16 %v806_v33, %v804_v32  ;;  %3125 = vmatpush3.bf16.xpose.msra.mxu1 %v1058_v34  ;;  %v3441_v27 = vld [vmem:[#allocation11 + $0x50] ss:$8 sps:$4 sm:$0xff]   ;;  %v3446_v28 = vld [vmem:[#allocation11 + $0x64] ss:$8 sps:$4 sm:$0xff]   ;;  %v3444_v29 = vld [vmem:[#allocation11 + $0x60] ss:$8 sps:$4 sm:$0xff]  }
 0x276   : > { %v809_v39 = vpack.c.bf16 %v4431_v36, %v4429_v35  ;;  %3130 = vmatprep.subr.bf16.mxu1 %v3992_v7  ;;  %v3449_v30 = vld [vmem:[#allocation11 + $0x74] ss:$8 sps:$4 sm:$0xff]   ;;  %v3447_v32 = vld [vmem:[#allocation11 + $0x70] ss:$8 sps:$4 sm:$0xff]   ;;  %v3994_v33 = vmov 0  }
 0x27c   : > { %3127 = vmatmul.mubr.bf16.vlgmr.msra.gmra.mrb[4].mxu1 %v808_v38 }
 0x27d   : > { %3132 = vmatprep.mubr.msk.bf16.mxu1 %vm3993_vm0, %v3992_v7 }
 0x2ae   : > { %v1299_v2 = vpop.f32.mrb[4].mxu0 }
 0x2af   : > { %v1301_v5 = vpop.f32.mrb[5].mxu0  ;;  %v1300_v43 = vadd.f32 %v1299_v2, %v1098_v0 }
 0x2b0   : > { %v4445_v41 = vadd.f32 %v1301_v5, %v1102_v1  ;;  %v1303_v42 = vpop.f32.mrb[6].mxu0 }
 0x2b1   : > { %v1304_v44 = vadd.f32 %v1303_v42, %v1098_v0  ;;  %v1305_v45 = vpop.f32.mrb[7].mxu0 }
 0x2b2   : > { %v4447_v46 = vadd.f32 %v1305_v45, %v1102_v1 }
 0x2b3   : > { %v1308_v47 = vpack.c.bf16 %v1304_v44, %v1300_v43 }
 0x2b4   : > { %v1309_v48 = vpack.c.bf16 %v4447_v46, %v4445_v41 }
 0x2b5   : > { %3131 = vmatpush3.bf16.msra.mxu1 %v1308_v47 }
 0x2b6   : > { %1528 = vmatprep.subr.bf16.mxu1 %v3428_v4  ;;  %v3467_v4 = vld [vmem:[#allocation11 + $0xd4] ss:$8 sps:$4 sm:$0xff]  }
 0x34f   : > { %v1344_v49 = vpop.f32.mrb[4].mxu1 }
 0x350   : > { %v3128_v50 = vpop.f32.mrb[5].mxu1  ;;  %v1352_v51 = vsel %vm1351_vm1, %v1344_v49, -inf }
 0x351   : > { %1353 = vmax.xlane.f32.xlu1 %v1352_v51  ;;  %v1347_v52 = vpop.f32.mrb[6].mxu1 }
 0x352   : > { %v3129_v53 = vpop.f32.mrb[7].mxu1  ;;  %v1355_v54 = vsel %vm1351_vm1, %v1347_v52, -inf }
 0x355   : > { %1356 = vmax.xlane.f32.xlu1 %v1355_v54 }
 0x3de   : > { %v1354_v55 = vpop.xlane.xlu1 %1353 }
 0x3df   : > { %v1358_v56 = vsub.f32 %v1344_v49, %v1354_v55  ;;  %v3450_v55 = vld [vmem:[#allocation11 + $0x80] ss:$8 sps:$4 sm:$0xff]  }
 0x3e1   : > { %v1360_v57 = vmul.f32 1.442695, %v1358_v56 }
 0x3e2   : > { %v1357_v58 = vpop.xlane.xlu1 %1356 }
 0x3e3   : > { %3622 = vpow2.f32 %v1360_v57  ;;  %v1359_v59 = vsub.f32 %v1347_v52, %v1357_v58  ;;  %v3455_v57 = vld [vmem:[#allocation11 + $0x94] ss:$8 sps:$4 sm:$0xff]   ;;  %v3453_v58 = vld [vmem:[#allocation11 + $0x90] ss:$8 sps:$4 sm:$0xff]  }
 0x3e5   : > { %v1362_v60 = vmul.f32 1.442695, %v1359_v59  ;;  %v3458_v59 = vld [vmem:[#allocation11 + $0xa4] ss:$8 sps:$4 sm:$0xff]  }
 0x3e7   : > { %3624 = vpow2.f32 %v1362_v60  ;;  %v3456_v60 = vld [vmem:[#allocation11 + $0xa0] ss:$8 sps:$4 sm:$0xff]  }
 0x3ed   : > { %v3623_v61 = vpop.eup %3622 }
 0x3ee   : > { %v1364_v62 = vsel %vm1351_vm1, %v3623_v61, 0.0 }
 0x3ef   : > { %1365 = vadd.xlane.f32.xlu0 %v1364_v62  ;;  %v3459_v62 = vld [vmem:[#allocation11 + $0xb0] ss:$8 sps:$4 sm:$0xff]  }
 0x3f1   : > { %v3625_v63 = vpop.eup %3624 }
 0x3f2   : > { %v1367_v3 = vsel %vm1351_vm1, %v3625_v63, 0.0 }
 0x3f3   : > { %1368 = vadd.xlane.f32.xlu1 %v1367_v3  ;;  %v3462_v3 = vld [vmem:[#allocation11 + $0xc0] ss:$8 sps:$4 sm:$0xff]  }
 0x47c   : > { %v1366_v6 = vpop.xlane.xlu0 %1365 }
 0x47d   : > { %3626 = vrcp.f32 %v1366_v6  ;;  %v3465_v6 = vld [vmem:[#allocation11 + $0xd0] ss:$8 sps:$4 sm:$0xff]  }
 0x480   : > { %v1369_v8 = vpop.xlane.xlu1 %1368 }
 0x481   : > { %3628 = vrcp.f32 %v1369_v8  ;;  %v3470_v8 = vld [vmem:[#allocation11 + $0xe4] ss:$8 sps:$4 sm:$0xff]  }
 0x487   : > { %v3627_v9 = vpop.eup %3626 }
 0x488   : > { %v1372_v11 = vmul.f32 %v3627_v9, %v3623_v61  ;;  %v3461_v61 = vld [vmem:[#allocation11 + $0xb4] ss:$8 sps:$4 sm:$0xff]   ;;  %v3468_v9 = vld [vmem:[#allocation11 + $0xe0] ss:$8 sps:$4 sm:$0xff]  }
 0x48b   : > { %v3629_v10 = vpop.eup %3628 }
 0x48c   : > { %v1373_v12 = vmul.f32 %v3629_v10, %v3625_v63  ;;  %v3464_v63 = vld [vmem:[#allocation11 + $0xc4] ss:$8 sps:$4 sm:$0xff]   ;;  %v3473_v10 = vld [vmem:[#allocation11 + $0xf4] ss:$8 sps:$4 sm:$0xff]  }
 0x48e   : > { %v1374_v14 = vpack.c.bf16 %v1373_v12, %v1372_v11  ;;  %v3471_v11 = vld [vmem:[#allocation11 + $0xf0] ss:$8 sps:$4 sm:$0xff]  }
 0x490   : > { %3133 = vmatmul.mubr.msk.bf16.vlgmr.msra.gmra.mrb[8].mxu1 %vm1351_vm1, %v1374_v14 }
 0x491   : > { %1529 = vmatpush1.bf16.msra.mxu1 %v3426_v13  ;;  %1560 = vmatprep.mubr.bf16.mxu1 %v3994_v33 }
 0x492   : > { %1530 = vmatprep.subr.bf16.mxu1 %v3431_v15 }
 0x495   : > { %1531 = vmatpush1.bf16.msra.mxu1 %v3429_v16 }
 0x496   : > { %1532 = vmatprep.subr.bf16.mxu1 %v3434_v17  ;;  %v1436_v17 = vld [vmem:[%s4636_s24] sm:$0x3] }
 0x499   : > { %1533 = vmatpush1.bf16.msra.mxu1 %v3432_v18  ;;  %v1441_v18 = vrot.slane %v1436_v17, %v4396_v24 }
 0x49a   : > { %1534 = vmatprep.subr.bf16.mxu1 %v3437_v19  ;;  %v1445_v19 = vrot.slane %v1436_v17, %v4394_v23  ;;  %v3533_v17 = vld [vmem:[#allocation14 + $0x94] ss:$8 sps:$4 sm:$0xff]  }
 0x49d   : > { %1535 = vmatpush1.bf16.msra.mxu1 %v3435_v21 }
 0x49e   : > { %1536 = vmatprep.subr.bf16.mxu1 %v3440_v22 }
 0x4a1   : > { %1537 = vmatpush1.bf16.msra.mxu1 %v3438_v25 }
 0x4a2   : > { %1538 = vmatprep.subr.bf16.mxu1 %v3443_v26 }
 0x4a5   : > { %1539 = vmatpush1.bf16.msra.mxu1 %v3441_v27 }
 0x4a6   : > { %1540 = vmatprep.subr.bf16.mxu1 %v3446_v28  ;;  %v3666_v28 = vld [vmem:[%s4352_s11] sm:$0xff] }
 0x4a9   : > { %1541 = vmatpush1.bf16.msra.mxu1 %v3444_v29 }
 0x4aa   : > { %1542 = vmatprep.subr.bf16.mxu1 %v3449_v30 }
 0x4ad   : > { %1543 = vmatpush1.bf16.msra.mxu1 %v3447_v32 }
 0x4ae   : > { %3136 = vmatprep.subr.bf16.mxu1 %v3992_v7 }
 0x563   : > { %v1412_v34 = vpop.f32.mrb[8].mxu1 }
 0x564   : > { %v3134_v38 = vpop.f32.mrb[9].mxu1 }
 0x565   : > { %v1415_v40 = vpop.f32.mrb[10].mxu1 }
 0x566   : > { %v1419_v1 = vpack.c.bf16 %v1415_v40, %v1412_v34  ;;  %v3135_v0 = vpop.f32.mrb[11].mxu1  ;;  %v3668_v40 = vld [vmem:[%s4352_s11 + $0x10] sm:$0xff] }
 0x568   : > { %1561 = vmatmul.mubr.bf16.vlgmr.msra.gmra.mrb[12].mxu1 %v1419_v1 }
 0x569   : > { %3137 = vmatpush3.bf16.xpose.msra.mxu1 %v1059_v37  ;;  %3138 = vmatprep.mubr.msk.bf16.mxu1 %vm3993_vm0, %v3992_v7 }
 0x56a   : > { %3142 = vmatprep.subr.bf16.mxu1 %v3992_v7 }
 0x570   : > { %3139 = vmatmul.mubr.bf16.vlgmr.msra.gmra.mrb[16].mxu1 %v809_v39 }
 0x571   : > { %3143 = vmatpush3.bf16.msra.mxu1 %v1309_v48  ;;  %3144 = vmatprep.mubr.msk.bf16.mxu1 %vm3993_vm0, %v3992_v7  ;;  %v3452_v48 = vld [vmem:[#allocation11 + $0x84] ss:$8 sps:$4 sm:$0xff]  }
 0x572   : > { %1780 = vmatprep.subr.bf16.mxu1 %v3452_v48  ;;  %v3491_v48 = vld [vmem:[#allocation14 + $0x24] ss:$8 sps:$4 sm:$0xff]  }
 0x643   : > { %v1609_v2 = vpop.f32.mrb[16].mxu1 }
 0x644   : > { %v3140_v5 = vpop.f32.mrb[17].mxu1  ;;  %v1616_v20 = vsel %vm1351_vm1, %v1609_v2, -inf }
 0x645   : > { %1617 = vmax.xlane.f32.xlu0 %v1616_v20  ;;  %v1612_v31 = vpop.f32.mrb[18].mxu1 }
 0x646   : > { %v3141_v37 = vpop.f32.mrb[19].mxu1  ;;  %v1619_v42 = vsel %vm1351_vm1, %v1612_v31, -inf }
 0x647   : > { %1620 = vmax.xlane.f32.xlu1 %v1619_v42 }
 0x6d2   : > { %v1618_v43 = vpop.xlane.xlu0 %1617 }
 0x6d3   : > { %v1622_v35 = vsub.f32 %v1609_v2, %v1618_v43  ;;  %v3669_v2 = vld [vmem:[%s4352_s11 + $0x18] sm:$0xff] }
 0x6d4   : > { %v1621_v36 = vpop.xlane.xlu1 %1620 }
 0x6d5   : > { %v1624_v39 = vmul.f32 1.442695, %v1622_v35  ;;  %v1623_v44 = vsub.f32 %v1612_v31, %v1621_v36  ;;  %v3474_v35 = vld [vmem:[#allocation12] ss:$8 sps:$4 sm:$0xff]   ;;  %v3476_v36 = vld [vmem:[#allocation12 + $0x4] ss:$8 sps:$4 sm:$0xff]  }
 0x6d6   : > { %2107 = vmatprep.subr.bf16.mxu0 %v3476_v36 }
 0x6d7   : > { %3630 = vpow2.f32 %v1624_v39  ;;  %v1626_v41 = vmul.f32 1.442695, %v1623_v44  ;;  %v3477_v39 = vld [vmem:[#allocation14] ss:$8 sps:$4 sm:$0xff]   ;;  %v3479_v44 = vld [vmem:[#allocation14 + $0x4] ss:$8 sps:$4 sm:$0xff]   ;;  %2108 = vmatpush1.bf16.msra.mxu0 %v3474_v35 }
 0x6d9   : > { %3632 = vpow2.f32 %v1626_v41  ;;  %v3482_v41 = vld [vmem:[#allocation12 + $0x14] ss:$8 sps:$4 sm:$0xff]  }
 0x6da   : > { %2109 = vmatprep.subr.bf16.mxu0 %v3482_v41  ;;  %v3539_v41 = vld [vmem:[#allocation14 + $0xa4] ss:$8 sps:$4 sm:$0xff]  }
 0x6e1   : > { %v3631_v45 = vpop.eup %3630 }
 0x6e2   : > { %v1628_v7 = vsel %vm1351_vm1, %v3631_v45, 0.0 }
 0x6e3   : > { %v3633_v46 = vpop.eup %3632  ;;  %1629 = vadd.xlane.f32.xlu0 %v1628_v7  ;;  %v3480_v7 = vld [vmem:[#allocation12 + $0x10] ss:$8 sps:$4 sm:$0xff]  }
 0x6e4   : > { %v1631_v47 = vsel %vm1351_vm1, %v3633_v46, 0.0  ;;  %2110 = vmatpush1.bf16.msra.mxu0 %v3480_v7  ;;  %v3537_v7 = vld [vmem:[#allocation14 + $0xa0] ss:$8 sps:$4 sm:$0xff]  }
 0x6e5   : > { %1632 = vadd.xlane.f32.xlu1 %v1631_v47  ;;  %v3488_v47 = vld [vmem:[#allocation12 + $0x24] ss:$8 sps:$4 sm:$0xff]  }
 0x6e6   : > { %2111 = vmatprep.subr.bf16.mxu0 %v3488_v47  ;;  %v3545_v47 = vld [vmem:[#allocation14 + $0xb4] ss:$8 sps:$4 sm:$0xff]  }
 0x770   : > { %v1630_v49 = vpop.xlane.xlu0 %1629 }
 0x771   : > { %3634 = vrcp.f32 %v1630_v49  ;;  %v3486_v49 = vld [vmem:[#allocation12 + $0x20] ss:$8 sps:$4 sm:$0xff]  }
 0x772   : > { %v1633_v50 = vpop.xlane.xlu1 %1632  ;;  %2112 = vmatpush1.bf16.msra.mxu0 %v3486_v49  ;;  %v3543_v49 = vld [vmem:[#allocation14 + $0xb0] ss:$8 sps:$4 sm:$0xff]  }
 0x773   : > { %3636 = vrcp.f32 %v1633_v50  ;;  %v3489_v50 = vld [vmem:[#allocation14 + $0x20] ss:$8 sps:$4 sm:$0xff]  }
 0x77b   : > { %v3635_v51 = vpop.eup %3634 }
 0x77c   : > { %v1636_v53 = vmul.f32 %v3635_v51, %v3631_v45  ;;  %v3485_v45 = vld [vmem:[#allocation14 + $0x14] ss:$8 sps:$4 sm:$0xff]  }
 0x77d   : > { %v3637_v52 = vpop.eup %3636  ;;  %v3494_v51 = vld [vmem:[#allocation12 + $0x34] ss:$8 sps:$4 sm:$0xff]  }
 0x77e   : > { %v1637_v54 = vmul.f32 %v3637_v52, %v3633_v46  ;;  %v3483_v46 = vld [vmem:[#allocation14 + $0x10] ss:$8 sps:$4 sm:$0xff]   ;;  %v3497_v52 = vld [vmem:[#allocation14 + $0x34] ss:$8 sps:$4 sm:$0xff]   ;;  %2113 = vmatprep.subr.bf16.mxu0 %v3494_v51  ;;  %v3548_v51 = vld [vmem:[#allocation12 + $0xc4] ss:$8 sps:$4 sm:$0xff]  }
 0x780   : > { %v1638_v56 = vpack.c.bf16 %v1637_v54, %v1636_v53  ;;  %v3492_v53 = vld [vmem:[#allocation12 + $0x30] ss:$8 sps:$4 sm:$0xff]  }
 0x781   : > { %v3495_v54 = vld [vmem:[#allocation14 + $0x30] ss:$8 sps:$4 sm:$0xff]   ;;  %2114 = vmatpush1.bf16.msra.mxu0 %v3492_v53  ;;  %v3551_v53 = vld [vmem:[#allocation14 + $0xc4] ss:$8 sps:$4 sm:$0xff]  }
 0x782   : > { %3145 = vmatmul.mubr.msk.bf16.vlgmr.msra.gmra.mrb[20].mxu1 %vm1351_vm1, %v1638_v56  ;;  %v3503_v56 = vld [vmem:[#allocation14 + $0x44] ss:$8 sps:$4 sm:$0xff]  }
 0x783   : > { %1781 = vmatpush1.bf16.msra.mxu1 %v3450_v55  ;;  %1812 = vmatprep.mubr.bf16.mxu1 %v3994_v33  ;;  %v3667_v33 = vld [vmem:[%s4352_s11 + $0x8] sm:$0xff]  ;;  %s4637_s11 = sld [smem:[#allocation27_spill]] }
 0x784   : > { %1782 = vmatprep.subr.bf16.mxu1 %v3455_v57  ;;  %v3500_v55 = vld [vmem:[#allocation12 + $0x44] ss:$8 sps:$4 sm:$0xff]   ;;  %v3498_v57 = vld [vmem:[#allocation12 + $0x40] ss:$8 sps:$4 sm:$0xff]  }
 0x785   : > { %2115 = vmatprep.subr.bf16.mxu0 %v3500_v55  ;;  %v3557_v55 = vld [vmem:[#allocation14 + $0xd4] ss:$8 sps:$4 sm:$0xff]  }
 0x786   : > { %2116 = vmatpush1.bf16.msra.mxu0 %v3498_v57  ;;  %v3555_v57 = vld [vmem:[#allocation14 + $0xd0] ss:$8 sps:$4 sm:$0xff]  }
 0x787   : > { %1783 = vmatpush1.bf16.msra.mxu1 %v3453_v58  ;;  %v3501_v58 = vld [vmem:[#allocation14 + $0x40] ss:$8 sps:$4 sm:$0xff]  }
 0x788   : > { %1784 = vmatprep.subr.bf16.mxu1 %v3458_v59  ;;  %v3506_v59 = vld [vmem:[#allocation12 + $0x54] ss:$8 sps:$4 sm:$0xff]  }
 0x789   : > { %2117 = vmatprep.subr.bf16.mxu0 %v3506_v59  ;;  %v3563_v59 = vld [vmem:[#allocation14 + $0xe4] ss:$8 sps:$4 sm:$0xff]   ;;  %s4550_s15 = scalar_lea.hbm %s4637_s11, %s3115_s21 }
 0x78b   : > { %1785 = vmatpush1.bf16.msra.mxu1 %v3456_v60  ;;  %v3509_v60 = vld [vmem:[#allocation14 + $0x54] ss:$8 sps:$4 sm:$0xff]  }
 0x78c   : > { %1786 = vmatprep.subr.bf16.mxu1 %v3461_v61  ;;  %v3504_v61 = vld [vmem:[#allocation12 + $0x50] ss:$8 sps:$4 sm:$0xff]  }
 0x78d   : > { %2118 = vmatpush1.bf16.msra.mxu0 %v3504_v61  ;;  %v3561_v61 = vld [vmem:[#allocation14 + $0xe0] ss:$8 sps:$4 sm:$0xff]  }
 0x78f   : > { %1787 = vmatpush1.bf16.msra.mxu1 %v3459_v62  ;;  %v3507_v62 = vld [vmem:[#allocation14 + $0x50] ss:$8 sps:$4 sm:$0xff]  }
 0x790   : > { %1788 = vmatprep.subr.bf16.mxu1 %v3464_v63  ;;  %v3512_v63 = vld [vmem:[#allocation12 + $0x64] ss:$8 sps:$4 sm:$0xff]  }
 0x791   : > { %2119 = vmatprep.subr.bf16.mxu0 %v3512_v63  ;;  %v3569_v63 = vld [vmem:[#allocation14 + $0xf4] ss:$8 sps:$4 sm:$0xff]  }
 0x793   : > { %1789 = vmatpush1.bf16.msra.mxu1 %v3462_v3  ;;  %v3515_v3 = vld [vmem:[#allocation14 + $0x64] ss:$8 sps:$4 sm:$0xff]  }
 0x794   : > { %1790 = vmatprep.subr.bf16.mxu1 %v3467_v4  ;;  %v3510_v4 = vld [vmem:[#allocation12 + $0x60] ss:$8 sps:$4 sm:$0xff]  }
 0x795   : > { %2120 = vmatpush1.bf16.msra.mxu0 %v3510_v4  ;;  %v3567_v4 = vld [vmem:[#allocation14 + $0xf0] ss:$8 sps:$4 sm:$0xff]  }
 0x797   : > { %1791 = vmatpush1.bf16.msra.mxu1 %v3465_v6  ;;  %v3513_v6 = vld [vmem:[#allocation14 + $0x60] ss:$8 sps:$4 sm:$0xff]  }
 0x798   : > { %1792 = vmatprep.subr.bf16.mxu1 %v3470_v8  ;;  %v3518_v8 = vld [vmem:[#allocation12 + $0x74] ss:$8 sps:$4 sm:$0xff]  }
 0x799   : > { %2121 = vmatprep.subr.bf16.mxu0 %v3518_v8 }
 0x79b   : > { %1793 = vmatpush1.bf16.msra.mxu1 %v3468_v9  ;;  %v3521_v9 = vld [vmem:[#allocation14 + $0x74] ss:$8 sps:$4 sm:$0xff]  }
 0x79c   : > { %1794 = vmatprep.subr.bf16.mxu1 %v3473_v10  ;;  %v3516_v10 = vld [vmem:[#allocation12 + $0x70] ss:$8 sps:$4 sm:$0xff]  }
 0x79d   : > { %2122 = vmatpush1.bf16.msra.mxu0 %v3516_v10 }
 0x79f   : > { %1795 = vmatpush1.bf16.msra.mxu1 %v3471_v11  ;;  %v3519_v11 = vld [vmem:[#allocation14 + $0x70] ss:$8 sps:$4 sm:$0xff]  }
 0x7a0   : > { %2342 = vmatprep.subr.bf16.mxu1 %v3479_v44 }
 0x855   : > { %v1676_v12 = vpop.f32.mrb[20].mxu1 }
 0x856   : > { %v3146_v13 = vpop.f32.mrb[21].mxu1 }
 0x857   : > { %v1679_v14 = vpop.f32.mrb[22].mxu1  ;;  %v3527_v13 = vld [vmem:[#allocation14 + $0x84] ss:$8 sps:$4 sm:$0xff]  }
 0x858   : > { %v1683_v15 = vpack.c.bf16 %v1679_v14, %v1676_v12  ;;  %v3147_v16 = vpop.f32.mrb[23].mxu1  ;;  %v3524_v12 = vld [vmem:[#allocation12 + $0x84] ss:$8 sps:$4 sm:$0xff]   ;;  %v3522_v14 = vld [vmem:[#allocation12 + $0x80] ss:$8 sps:$4 sm:$0xff]  }
 0x859   : > { %2123 = vmatprep.subr.bf16.mxu0 %v3524_v12  ;;  %v3530_v16 = vld [vmem:[#allocation12 + $0x94] ss:$8 sps:$4 sm:$0xff]  }
 0x85a   : > { %1813 = vmatmul.mubr.bf16.vlgmr.msra.gmra.mrb[12].mxu1 %v1683_v15  ;;  %v3525_v15 = vld [vmem:[#allocation14 + $0x80] ss:$8 sps:$4 sm:$0xff]   ;;  %2124 = vmatpush1.bf16.msra.mxu0 %v3522_v14 }
 0x85b   : > { %2343 = vmatpush1.bf16.msra.mxu1 %v3477_v39  ;;  %2125 = vmatprep.subr.bf16.mxu0 %v3530_v16  ;;  %v2875_v14 = vld [vmem:[%s4606_s10 + $0x2] ss:$4 sm:$0x3] }
 0x85c   : > { %2344 = vmatprep.subr.bf16.mxu1 %v3485_v45  ;;  %v3534_v45 = vld [vmem:[#allocation12 + $0xa0] ss:$8 sps:$4 sm:$0xff]  }
 0x85f   : > { %2345 = vmatpush1.bf16.msra.mxu1 %v3483_v46  ;;  %v3542_v46 = vld [vmem:[#allocation12 + $0xb4] ss:$8 sps:$4 sm:$0xff]  }
 0x860   : > { %2346 = vmatprep.subr.bf16.mxu1 %v3491_v48  ;;  %v3540_v48 = vld [vmem:[#allocation12 + $0xb0] ss:$8 sps:$4 sm:$0xff]  }
 0x863   : > { %2347 = vmatpush1.bf16.msra.mxu1 %v3489_v50  ;;  %v3546_v50 = vld [vmem:[#allocation12 + $0xc0] ss:$8 sps:$4 sm:$0xff]  }
 0x864   : > { %2348 = vmatprep.subr.bf16.mxu1 %v3497_v52  ;;  %v3549_v52 = vld [vmem:[#allocation14 + $0xc0] ss:$8 sps:$4 sm:$0xff]  }
 0x867   : > { %2349 = vmatpush1.bf16.msra.mxu1 %v3495_v54  ;;  %v3554_v54 = vld [vmem:[#allocation12 + $0xd4] ss:$8 sps:$4 sm:$0xff]  }
 0x868   : > { %2350 = vmatprep.subr.bf16.mxu1 %v3503_v56  ;;  %v3552_v56 = vld [vmem:[#allocation12 + $0xd0] ss:$8 sps:$4 sm:$0xff]  }
 0x86b   : > { %2351 = vmatpush1.bf16.msra.mxu1 %v3501_v58  ;;  %v3560_v58 = vld [vmem:[#allocation12 + $0xe4] ss:$8 sps:$4 sm:$0xff]  }
 0x86c   : > { %2352 = vmatprep.subr.bf16.mxu1 %v3509_v60  ;;  %v3558_v60 = vld [vmem:[#allocation12 + $0xe0] ss:$8 sps:$4 sm:$0xff]  }
 0x86f   : > { %2353 = vmatpush1.bf16.msra.mxu1 %v3507_v62  ;;  %v3566_v62 = vld [vmem:[#allocation12 + $0xf4] ss:$8 sps:$4 sm:$0xff]  }
 0x870   : > { %2354 = vmatprep.subr.bf16.mxu1 %v3515_v3  ;;  %v3564_v3 = vld [vmem:[#allocation12 + $0xf0] ss:$8 sps:$4 sm:$0xff]  }
 0x873   : > { %2355 = vmatpush1.bf16.msra.mxu1 %v3513_v6  ;;  %v3572_v6 = vld [vmem:[#allocation15 + $0x4] ss:$8 sps:$4 sm:$0xff]  }
 0x874   : > { %2356 = vmatprep.subr.bf16.mxu1 %v3521_v9 }
 0x877   : > { %2357 = vmatpush1.bf16.msra.mxu1 %v3519_v11 }
 0x878   : > { %2358 = vmatprep.subr.bf16.mxu1 %v3527_v13 }
 0x87b   : > { %2359 = vmatpush1.bf16.msra.mxu1 %v3525_v15 }
 0x87c   : > { %2360 = vmatprep.subr.bf16.mxu1 %v3533_v17  ;;  %v1902_v17 = vrot.slane %v2875_v14, %v4396_v24 }
 0x92d   : > { %v1814_v21 = vpop.f32.mrb[12].mxu1 }
 0x92e   : > { %v3148_v22 = vadd.f32 %v1814_v21, %v1441_v18  ;;  %v1816_v25 = vpop.f32.mrb[13].mxu1 }
 0x92f   : > { %v3149_v26 = vadd.f32 %v1816_v25, %v1445_v19  ;;  %v1818_v27 = vpop.f32.mrb[14].mxu1 }
 0x930   : > { %v4482_v29 = vadd.f32 %v3666_v28, %v3148_v22  ;;  %v3150_v30 = vadd.f32 %v1818_v27, %v1441_v18  ;;  %v1820_v32 = vpop.f32.mrb[15].mxu1  ;;  %v3528_v18 = vld [vmem:[#allocation12 + $0x90] ss:$8 sps:$4 sm:$0xff]  }
 0x931   : > { %v4485_v34 = vadd.f32 %v3667_v33, %v3149_v26  ;;  %v3151_v38 = vadd.f32 %v1820_v32, %v1445_v19  ;;  %v3531_v19 = vld [vmem:[#allocation14 + $0x90] ss:$8 sps:$4 sm:$0xff]   ;;  %2126 = vmatpush1.bf16.msra.mxu0 %v3528_v18  ;;  %v1906_v18 = vrot.slane %v2875_v14, %v4394_v23 }
 0x932   : > { %v4488_v1 = vadd.f32 %v3668_v40, %v3150_v30  ;;  %v1843_v0 = vmul.f32 %v4482_v29, %v4482_v29  ;;  %2361 = vmatpush1.bf16.msra.mxu1 %v3531_v19  ;;  %v2874_v30 = vld [vmem:[%s4606_s10 + $0x1] ss:$4 sm:$0x3] }
 0x933   : > { %v4493_v5 = vadd.f32 %v3669_v2, %v3151_v38  ;;  %v1844_v20 = vmul.f32 %v4485_v34, %v4485_v34  ;;  %v1867_v32 = vrot.slane %v2874_v30, %v4396_v24  ;;  %v1871_v33 = vrot.slane %v2874_v30, %v4394_v23  ;;  %2362 = vmatprep.subr.bf16.mxu1 %v3539_v41  ;;  %v3593_v41 = vld [vmem:[#allocation15 + $0x74] ss:$8 sps:$4 sm:$0xff]  }
 0x934   : > { %v1845_v31 = vmul.f32 %v4488_v1, %v4488_v1 }
 0x935   : > { %v1847_v37 = vadd.f32 %v1844_v20, %v1843_v0  ;;  %v1846_v42 = vmul.f32 %v4493_v5, %v4493_v5 }
 0x936   : > { %2363 = vmatpush1.bf16.msra.mxu1 %v3537_v7  ;;  %v3596_v7 = vld [vmem:[#allocation15 + $0x84] ss:$8 sps:$4 sm:$0xff]  }
 0x937   : > { %1848 = vadd.xlane.f32.xlu0 %v1847_v37  ;;  %v1850_v43 = vadd.f32 %v1846_v42, %v1845_v31  ;;  %2364 = vmatprep.subr.bf16.mxu1 %v3545_v47  ;;  %v3599_v47 = vld [vmem:[#allocation15 + $0x94] ss:$8 sps:$4 sm:$0xff]  }
 0x939   : > { %1851 = vadd.xlane.f32.xlu1 %v1850_v43 }
 0x93a   : > { %2365 = vmatpush1.bf16.msra.mxu1 %v3543_v49  ;;  %v3602_v49 = vld [vmem:[#allocation15 + $0xa4] ss:$8 sps:$4 sm:$0xff]  }
 0x93b   : > { %2366 = vmatprep.subr.bf16.mxu1 %v3551_v53  ;;  %v3608_v53 = vld [vmem:[#allocation15 + $0xc4] ss:$8 sps:$4 sm:$0xff]  }
 0x93e   : > { %2367 = vmatpush1.bf16.msra.mxu1 %v3549_v52  ;;  %v3603_v52 = vld [vmem:[#allocation15 + $0xb0] ss:$8 sps:$4 sm:$0xff]  }
 0x93f   : > { %2368 = vmatprep.subr.bf16.mxu1 %v3557_v55  ;;  %v3611_v55 = vld [vmem:[#allocation15 + $0xd4] ss:$8 sps:$4 sm:$0xff]  }
 0x942   : > { %2369 = vmatpush1.bf16.msra.mxu1 %v3555_v57  ;;  %v3614_v57 = vld [vmem:[#allocation15 + $0xe4] ss:$8 sps:$4 sm:$0xff]  }
 0x943   : > { %2370 = vmatprep.subr.bf16.mxu1 %v3563_v59  ;;  %v3617_v59 = vld [vmem:[#allocation15 + $0xf4] ss:$8 sps:$4 sm:$0xff]  }
 0x946   : > { %2371 = vmatpush1.bf16.msra.mxu1 %v3561_v61 }
 0x947   : > { %2372 = vmatprep.subr.bf16.mxu1 %v3569_v63 }
 0x94a   : > { %2373 = vmatpush1.bf16.msra.mxu1 %v3567_v4 }
 0x9c4   : > { %v1849_v21 = vpop.xlane.xlu0 %1848 }
 0x9c5   : > { %v1853_v22 = vmul.f32 0.00390625, %v1849_v21 }
 0x9c6   : > { %v1852_v25 = vpop.xlane.xlu1 %1851 }
 0x9c7   : > { %v1855_v26 = vadd.f32 1e-06, %v1853_v22  ;;  %v1854_v27 = vmul.f32 0.00390625, %v1852_v25 }
 0x9c9   : > { %3638 = vrsqrt.f32 %v1855_v26  ;;  %v1856_v28 = vadd.f32 1e-06, %v1854_v27 }
 0x9cb   : > { %3640 = vrsqrt.f32 %v1856_v28 }
 0x9d3   : > { %v3639_v38 = vpop.eup %3638 }
 0x9d4   : > { %v1859_v40 = vmul.f32 %v3639_v38, %v4482_v29  ;;  %v1860_v0 = vmul.f32 %v3639_v38, %v4485_v34  ;;  %v3570_v38 = vld [vmem:[#allocation15] ss:$8 sps:$4 sm:$0xff]  }
 0x9d5   : > { %v3641_v2 = vpop.eup %3640 }
 0x9d6   : > { %v4508_v20 = vmul.f32 %v1867_v32, %v1859_v40  ;;  %v4510_v31 = vmul.f32 %v1871_v33, %v1860_v0  ;;  %v1861_v37 = vmul.f32 %v3641_v2, %v4488_v1  ;;  %v1862_v42 = vmul.f32 %v3641_v2, %v4493_v5  ;;  %v3536_v5 = vld [vmem:[#allocation12 + $0xa4] ss:$8 sps:$4 sm:$0xff]   ;;  %v3575_v40 = vld [vmem:[#allocation15 + $0x14] ss:$8 sps:$4 sm:$0xff]   ;;  %v3573_v0 = vld [vmem:[#allocation15 + $0x10] ss:$8 sps:$4 sm:$0xff]  }
 0x9d7   : > { %2127 = vmatprep.subr.bf16.mxu0 %v3536_v5  ;;  %v3578_v2 = vld [vmem:[#allocation15 + $0x24] ss:$8 sps:$4 sm:$0xff]   ;;  %v3588_v5 = vld [vmem:[#allocation15 + $0x60] ss:$8 sps:$4 sm:$0xff]  }
 0x9d8   : > { %v1878_v43 = vmul.f32 %v4508_v20, %v4508_v20  ;;  %v1879_v35 = vmul.f32 %v4510_v31, %v4510_v31  ;;  %v4518_v36 = vmul.f32 %v1867_v32, %v1861_v37  ;;  %v4520_v29 = vmul.f32 %v1871_v33, %v1862_v42  ;;  %2128 = vmatpush1.bf16.msra.mxu0 %v3534_v45  ;;  %v3576_v37 = vld [vmem:[#allocation15 + $0x20] ss:$8 sps:$4 sm:$0xff]   ;;  %v3581_v42 = vld [vmem:[#allocation15 + $0x34] ss:$8 sps:$4 sm:$0xff]   ;;  %v3591_v45 = vld [vmem:[#allocation15 + $0x70] ss:$8 sps:$4 sm:$0xff]  }
 0x9d9   : > { %2129 = vmatprep.subr.bf16.mxu0 %v3542_v46  ;;  %v3594_v46 = vld [vmem:[#allocation15 + $0x80] ss:$8 sps:$4 sm:$0xff]  }
 0x9da   : > { %v1882_v34 = vadd.f32 %v1879_v35, %v1878_v43  ;;  %v1880_v39 = vmul.f32 %v4518_v36, %v4518_v36  ;;  %v1881_v44 = vmul.f32 %v4520_v29, %v4520_v29  ;;  %v3579_v43 = vld [vmem:[#allocation15 + $0x30] ss:$8 sps:$4 sm:$0xff]   ;;  %v3584_v35 = vld [vmem:[#allocation15 + $0x44] ss:$8 sps:$4 sm:$0xff]  }
 0x9dc   : > { %1883 = vadd.xlane.f32.xlu0 %v1882_v34  ;;  %v1885_v1 = vadd.f32 %v1881_v44, %v1880_v39  ;;  %2130 = vmatpush1.bf16.msra.mxu0 %v3540_v48  ;;  %v3582_v34 = vld [vmem:[#allocation15 + $0x40] ss:$8 sps:$4 sm:$0xff]   ;;  %v3587_v39 = vld [vmem:[#allocation15 + $0x54] ss:$8 sps:$4 sm:$0xff]   ;;  %v3585_v44 = vld [vmem:[#allocation15 + $0x50] ss:$8 sps:$4 sm:$0xff]  }
 0x9dd   : > { %2131 = vmatprep.subr.bf16.mxu0 %v3548_v51  ;;  %v3597_v48 = vld [vmem:[#allocation15 + $0x90] ss:$8 sps:$4 sm:$0xff]   ;;  %v3605_v51 = vld [vmem:[#allocation15 + $0xb4] ss:$8 sps:$4 sm:$0xff]  }
 0x9de   : > { %1886 = vadd.xlane.f32.xlu1 %v1885_v1  ;;  %v3590_v1 = vld [vmem:[#allocation15 + $0x64] ss:$8 sps:$4 sm:$0xff]  }
 0x9e0   : > { %2132 = vmatpush1.bf16.msra.mxu0 %v3546_v50  ;;  %v3600_v50 = vld [vmem:[#allocation15 + $0xa0] ss:$8 sps:$4 sm:$0xff]  }
 0x9e1   : > { %2133 = vmatprep.subr.bf16.mxu0 %v3554_v54  ;;  %v3606_v54 = vld [vmem:[#allocation15 + $0xc0] ss:$8 sps:$4 sm:$0xff]  }
 0x9e4   : > { %2134 = vmatpush1.bf16.msra.mxu0 %v3552_v56  ;;  %v3609_v56 = vld [vmem:[#allocation15 + $0xd0] ss:$8 sps:$4 sm:$0xff]  }
 0x9e5   : > { %2135 = vmatprep.subr.bf16.mxu0 %v3560_v58  ;;  %v3612_v58 = vld [vmem:[#allocation15 + $0xe0] ss:$8 sps:$4 sm:$0xff]  }
 0x9e8   : > { %2136 = vmatpush1.bf16.msra.mxu0 %v3558_v60  ;;  %v3615_v60 = vld [vmem:[#allocation15 + $0xf0] ss:$8 sps:$4 sm:$0xff]  }
 0x9e9   : > { %2137 = vmatprep.subr.bf16.mxu0 %v3566_v62 }
 0x9ec   : > { %2138 = vmatpush1.bf16.msra.mxu0 %v3564_v3 }
 0x9ed   : > { %2611 = vmatprep.subr.bf16.mxu0 %v3572_v6 }
 0xa69   : > { %v1884_v8 = vpop.xlane.xlu0 %1883 }
 0xa6a   : > { %v1888_v9 = vmul.f32 0.00390625, %v1884_v8 }
 0xa6b   : > { %v1887_v10 = vpop.xlane.xlu1 %1886 }
 0xa6c   : > { %v1890_v11 = vadd.f32 1e-06, %v1888_v9  ;;  %v1889_v12 = vmul.f32 0.00390625, %v1887_v10 }
 0xa6e   : > { %3642 = vrsqrt.f32 %v1890_v11  ;;  %v1891_v13 = vadd.f32 1e-06, %v1889_v12 }
 0xa70   : > { %3644 = vrsqrt.f32 %v1891_v13 }
 0xa78   : > { %v3643_v15 = vpop.eup %3642 }
 0xa79   : > { %v1895_v16 = vmul.f32 %v3643_v15, %v4510_v31  ;;  %v1894_v19 = vmul.f32 %v3643_v15, %v4508_v20 }
 0xa7a   : > { %v3645_v21 = vpop.eup %3644 }
 0xa7b   : > { %v1897_v22 = vmul.f32 %v3645_v21, %v4520_v29  ;;  %v1896_v25 = vmul.f32 %v3645_v21, %v4518_v36  ;;  %v1910_v26 = vmul.f32 %v1906_v18, %v1895_v16  ;;  %v1909_v28 = vmul.f32 %v1902_v17, %v1894_v19 }
 0xa7d   : > { %v1912_v27 = vmul.f32 %v1906_v18, %v1897_v22  ;;  %v1911_v30 = vmul.f32 %v1902_v17, %v1896_v25 }
 0xa7f   : > { %v1914_v32 = vpack.c.bf16 %v1912_v27, %v1910_v26  ;;  %v1913_v33 = vpack.c.bf16 %v1911_v30, %v1909_v28 }
 0xa81   : > { %2139 = vmatprep.mubr.bf16.mxu0 %v1914_v32  ;;  %2374 = vmatprep.mubr.bf16.mxu1 %v1914_v32 }
 0xa82   : > { %2140 = vmatmul.mubr.bf16.vlgmr.msra.gmra.mrb[8].mxu0 %v1913_v33  ;;  %2375 = vmatmul.mubr.bf16.vlgmr.msra.gmra.mrb[24].mxu1 %v1913_v33 }
 0xa83   : > { %2612 = vmatpush1.bf16.msra.mxu0 %v3570_v38 }
 0xa84   : > { %2613 = vmatprep.subr.bf16.mxu0 %v3575_v40 }
 0xa87   : > { %2614 = vmatpush1.bf16.msra.mxu0 %v3573_v0 }
 0xa88   : > { %2615 = vmatprep.subr.bf16.mxu0 %v3578_v2 }
 0xa8b   : > { %2616 = vmatpush1.bf16.msra.mxu0 %v3576_v37 }
 0xa8c   : > { %2617 = vmatprep.subr.bf16.mxu0 %v3581_v42 }
 0xa8f   : > { %2618 = vmatpush1.bf16.msra.mxu0 %v3579_v43 }
 0xa90   : > { %2619 = vmatprep.subr.bf16.mxu0 %v3584_v35 }
 0xa93   : > { %2620 = vmatpush1.bf16.msra.mxu0 %v3582_v34 }
 0xa94   : > { %2621 = vmatprep.subr.bf16.mxu0 %v3587_v39 }
 0xa97   : > { %2622 = vmatpush1.bf16.msra.mxu0 %v3585_v44 }
 0xa98   : > { %2623 = vmatprep.subr.bf16.mxu0 %v3590_v1 }
 0xa9b   : > { %2624 = vmatpush1.bf16.msra.mxu0 %v3588_v5 }
 0xa9c   : > { %2625 = vmatprep.subr.bf16.mxu0 %v3593_v41 }
 0xa9f   : > { %2626 = vmatpush1.bf16.msra.mxu0 %v3591_v45 }
 0xaa0   : > { %2627 = vmatprep.subr.bf16.mxu0 %v3596_v7 }
 0xaa3   : > { %2628 = vmatpush1.bf16.msra.mxu0 %v3594_v46 }
 0xaa4   : > { %2629 = vmatprep.subr.bf16.mxu0 %v3599_v47 }
 0xaa7   : > { %2630 = vmatpush1.bf16.msra.mxu0 %v3597_v48 }
 0xaa8   : > { %2631 = vmatprep.subr.bf16.mxu0 %v3602_v49 }
 0xaab   : > { %2632 = vmatpush1.bf16.msra.mxu0 %v3600_v50 }
 0xaac   : > { %2633 = vmatprep.subr.bf16.mxu0 %v3605_v51 }
 0xaaf   : > { %2634 = vmatpush1.bf16.msra.mxu0 %v3603_v52 }
 0xab0   : > { %2635 = vmatprep.subr.bf16.mxu0 %v3608_v53 }
 0xab3   : > { %2636 = vmatpush1.bf16.msra.mxu0 %v3606_v54 }
 0xab4   : > { %2637 = vmatprep.subr.bf16.mxu0 %v3611_v55 }
 0xab7   : > { %2638 = vmatpush1.bf16.msra.mxu0 %v3609_v56 }
 0xab8   : > { %2639 = vmatprep.subr.bf16.mxu0 %v3614_v57 }
 0xabb   : > { %2640 = vmatpush1.bf16.msra.mxu0 %v3612_v58 }
 0xabc   : > { %2641 = vmatprep.subr.bf16.mxu0 %v3617_v59 }
 0xabf   : > { %2642 = vmatpush1.bf16.msra.mxu0 %v3615_v60 }
 0xb55   : > { %v2141_v61 = vpop.f32.mrb[8].mxu0  ;;  %v2376_v62 = vpop.f32.mrb[24].mxu1 }
 0xb56   : > { %v3073_v63 = vmul.f32 -1.442695, %v2141_v61  ;;  %v2143_v3 = vpop.f32.mrb[9].mxu0  ;;  %v2378_v4 = vpop.f32.mrb[25].mxu1 }
 0xb57   : > { %v3074_v6 = vmul.f32 -1.442695, %v2143_v3  ;;  %v2145_v8 = vpop.f32.mrb[10].mxu0  ;;  %v2380_v9 = vpop.f32.mrb[26].mxu1 }
 0xb58   : > { %3646 = vpow2.f32 %v3073_v63  ;;  %v3075_v10 = vmul.f32 -1.442695, %v2145_v8  ;;  %v2147_v11 = vpop.f32.mrb[11].mxu0  ;;  %v2382_v12 = vpop.f32.mrb[27].mxu1 }
 0xb59   : > { %3648 = vpow2.f32 %v3074_v6  ;;  %v3076_v13 = vmul.f32 -1.442695, %v2147_v11 }
 0xb5a   : > { %3650 = vpow2.f32 %v3075_v10 }
 0xb5b   : > { %3652 = vpow2.f32 %v3076_v13 }
 0xb62   : > { %v3647_v14 = vpop.eup %3646 }
 0xb63   : > { %v3649_v15 = vpop.eup %3648  ;;  %v2397_v16 = vadd.f32 1.0, %v3647_v14 }
 0xb64   : > { %v3651_v17 = vpop.eup %3650  ;;  %v2398_v18 = vadd.f32 1.0, %v3649_v15 }
 0xb65   : > { %v3653_v19 = vpop.eup %3652  ;;  %3654 = vrcp.f32 %v2397_v16  ;;  %v2399_v21 = vadd.f32 1.0, %v3651_v17 }
 0xb66   : > { %3656 = vrcp.f32 %v2398_v18  ;;  %v2400_v22 = vadd.f32 1.0, %v3653_v19 }
 0xb67   : > { %3658 = vrcp.f32 %v2399_v21 }
 0xb68   : > { %3660 = vrcp.f32 %v2400_v22 }
 0xb6f   : > { %v3655_v25 = vpop.eup %3654 }
 0xb70   : > { %v3657_v26 = vpop.eup %3656  ;;  %v2409_v27 = vmul.f32 %v3655_v25, %v2141_v61 }
 0xb71   : > { %v3659_v28 = vpop.eup %3658  ;;  %v2410_v30 = vmul.f32 %v3657_v26, %v2143_v3 }
 0xb72   : > { %v3661_v32 = vpop.eup %3660  ;;  %v2413_v33 = vmul.f32 %v2409_v27, %v2376_v62  ;;  %v2411_v38 = vmul.f32 %v3659_v28, %v2145_v8 }
 0xb73   : > { %v2414_v40 = vmul.f32 %v2410_v30, %v2378_v4  ;;  %v2412_v0 = vmul.f32 %v3661_v32, %v2147_v11 }
 0xb74   : > { %v2415_v2 = vmul.f32 %v2411_v38, %v2380_v9 }
 0xb75   : > { %v2416_v37 = vmul.f32 %v2412_v0, %v2382_v12 }
 0xb76   : > { %v2417_v42 = vpack.c.bf16 %v2415_v2, %v2413_v33 }
 0xb77   : > { %v2418_v43 = vpack.c.bf16 %v2416_v37, %v2414_v40 }
 0xb79   : > { %2643 = vmatprep.mubr.bf16.mxu0 %v2418_v43 }
 0xb7a   : > { %2644 = vmatmul.mubr.bf16.vlgmr.msra.gmra.mrb[12].mxu0 %v2417_v42 }
 0xc4d   : > { %v2645_v35 = vpop.f32.mrb[12].mxu0 }
 0xc4e   : > { %v2654_v34 = vadd.f32 %v2645_v35, %v4508_v20  ;;  %v2647_v39 = vpop.f32.mrb[13].mxu0 }
 0xc4f   : > { %v2655_v44 = vadd.f32 %v2647_v39, %v4510_v31  ;;  %v2649_v1 = vpop.f32.mrb[14].mxu0 }
 0xc50   : > { %v2658_v5 = vmul.f32 %v2654_v34, %v2654_v34  ;;  %v2656_v41 = vadd.f32 %v2649_v1, %v4518_v36  ;;  %v2651_v45 = vpop.f32.mrb[15].mxu0  ;;  %v2876_v36 = vld [vmem:[%s4606_s10 + $0x3] ss:$4 sm:$0x3] }
 0xc51   : > { %v2659_v7 = vmul.f32 %v2655_v44, %v2655_v44  ;;  %v2657_v46 = vadd.f32 %v2651_v45, %v4520_v29  ;;  %v2682_v29 = vrot.slane %v2876_v36, %v4396_v24  ;;  %v2686_v55 = vrot.slane %v2876_v36, %v4394_v23 }
 0xc52   : > { %v2660_v47 = vmul.f32 %v2656_v41, %v2656_v41 }
 0xc53   : > { %v2661_v48 = vmul.f32 %v2657_v46, %v2657_v46  ;;  %v2662_v49 = vadd.f32 %v2659_v7, %v2658_v5 }
 0xc55   : > { %2663 = vadd.xlane.f32.xlu0 %v2662_v49  ;;  %v2665_v50 = vadd.f32 %v2661_v48, %v2660_v47 }
 0xc57   : > { %2666 = vadd.xlane.f32.xlu1 %v2665_v50 }
 0xce2   : > { %v2664_v20 = vpop.xlane.xlu0 %2663 }
 0xce3   : > { %v2668_v51 = vmul.f32 0.00390625, %v2664_v20 }
 0xce4   : > { %v2667_v52 = vpop.xlane.xlu1 %2666 }
 0xce5   : > { %v2670_v31 = vadd.f32 1e-06, %v2668_v51  ;;  %v2669_v53 = vmul.f32 0.00390625, %v2667_v52 }
 0xce7   : > { %3662 = vrsqrt.f32 %v2670_v31  ;;  %v2671_v54 = vadd.f32 1e-06, %v2669_v53 }
 0xce9   : > { %3664 = vrsqrt.f32 %v2671_v54 }
 0xcf1   : > { %v3663_v56 = vpop.eup %3662 }
 0xcf2   : > { %v2674_v57 = vmul.f32 %v3663_v56, %v2654_v34  ;;  %v2675_v58 = vmul.f32 %v3663_v56, %v2655_v44 }
 0xcf3   : > { %v3665_v59 = vpop.eup %3664 }
 0xcf4   : > { %v2689_v60 = vmul.f32 %v2682_v29, %v2674_v57  ;;  %v2690_v61 = vmul.f32 %v2686_v55, %v2675_v58  ;;  %v2676_v62 = vmul.f32 %v3665_v59, %v2656_v41  ;;  %v2677_v63 = vmul.f32 %v3665_v59, %v2657_v46 }
 0xcf6   : > { %2693 = vst [vmem:[%s506_s29] sm:$0xff] %v2689_v60  ;;  %2694 = vst [vmem:[%s506_s29 + $0x8] sm:$0xff] %v2690_v61  ;;  %v2691_v23 = vmul.f32 %v2682_v29, %v2676_v62  ;;  %v2692_v24 = vmul.f32 %v2686_v55, %v2677_v63 }
 0xcf8   : > { %2695 = vst [vmem:[%s506_s29 + $0x10] sm:$0xff] %v2691_v23  ;;  %2696 = vst [vmem:[%s506_s29 + $0x18] sm:$0xff] %v2692_v24 }
 0xcf9   : > { %3909 = shalt.err (!%p3906_p10)
}
 0xcfa   : > { %s3910_s1 = scalar_lea.hbm %s4550_s15, 512  ;;  %s3914_s12 = scalar_lea.hbm %s4637_s11, 1024 }
 0xcfb   : > { %p3911_p11 = scmp.ne.s32.totalorder %s4550_s15, %s3910_s1  ;;  %p3915_p9 = scmp.lt.u32.totalorder %s4550_s15, %s4637_s11 }
 0xcfc   : > { %p3916_p7 = scmp.lt.u32.totalorder %s3914_s12, %s3910_s1  ;;  %p3918_p12 = scmp.lt.u32.totalorder %s3910_s1, %s4550_s15 }
 0xcfd   : > { %p3912_p3 = pnand %p3911_p11, %p4638_p1 }
 0xcfe   : > { %p3917_p4 = por %p3916_p7, %p3915_p9 }
 0xcff   : > { %p3913_p5 = pneg %p3912_p3 }
 0xd00   : > { %p3919_p13 = por %p3918_p12, %p3917_p4 }
 0xd02   : > { %p3920_p0 = pnand %p3919_p13, %p3913_p5 }
 0xd04   : > { %3923 = shalt.err (!%p3920_p0)
}
 0xd05   : > { %s3996_s26 = smov 256   ;;  %s3997_s8 = smov 16  }
 0xd06   : > { %3186 = dma.vmem_to_hbm [thread:$0]  (%p4638_p1), %s4552_s25, 512, %s4550_s15, %s2698_s23, %s3996_s26, %s3996_s26, %s3997_s8  }
 0xd07 PF: > { %s2726_s27 = sand.u32 1, %s3966_s17   ;;  %p4639_p2 = scmp.ne.s32.totalorder %s4624_s13, 0 }
 0xd08   : > { %p4640_p8 = scmp.ge.s32.totalorder %s3978_s20, 2  ;;  %s2727_s1 = scalar_lea.sflag [#allocation5], %s2726_s27 }
 0xd0a   : > { %p3215_p6 = pnand %p4640_p8, %p4639_p2 }
 0xd0c   : > { %3961 = dma.done.wait (!%p3215_p6), %s2727_s1, 512  }
 0xd0d   : > { %3963 = vsyncadd (!%p3215_p6), %s2727_s1, 4294966784  ;;  %p28_p10 = scmp.ge.s32.totalorder %s4273_s16, 4   ;;  %s4641_s17 = smov %s3970_s18 }
 0xd0e   : > { %s4642_s18 = smov %s3974_s19  ;;  %s4643_s19 = smov %s4285_s9 }
 0xd0f   : > { %s4644_s20 = smov %s4273_s16  ;;  %30 = sbr.rel (!%p28_p10) target bundleno = 14 (0xe), region = 142 }
 0xd16   :  { %2732 = vsyncpa [#allocation4], 1 }
 0xd17   :  { %2734 = vsyncpa [#allocation4 + $0x1], 1 }
 0xd18   :  { %2735 = vsyncpa [#allocation7], 1 }
 0xd19   :  { %2736 = vsyncpa [#allocation10], 1 }
 0xd1a   :  { %2737 = vsyncpa [#allocation13], 1 }
 0xd1b   :  { %2738 = vsyncpa [#allocation16], 1 }
 0xd1c   :  { %2739 = vsyncpa [#allocation5], 1 }
 0xd1d   :  { %2741 = vsyncpa [#allocation5 + $0x1], 1 }

</bundles_post_ra>
